<compile_context>
chip_gen: v5e
topology: v5e:2x2
jax: 0.10.0
libtpu: 0.0.40
codegen_flags: <defaults>
</compile_context>

<pallas_src>
import functools
import math

import jax
import jax.numpy as jnp
from jax.experimental import pallas as pl
from jax.experimental.pallas import tpu as pltpu

LN_EPS = 1e-5
LANE = 128
SUBLANE = 8


def _ceil_to(a, m):
    return -(-a // m) * m


# ----------------------------------------------------------------------------
# Fused forward kernel: the whole network as straight-line code over 3 refs
# ----------------------------------------------------------------------------
def _fused_forward_kernel(layout, L, noise_dim, hidden, ctx_off,
                          inp_ref, w_ref, v_ref, o_ref):
    """inp_ref: (Bp, in_width) packed [x | beta | pad | context | pad]
       w_ref  : (W_rows, 128)  all weight matrices stacked (8-row aligned)
       v_ref  : (V_rows, 128)  all bias / LN vectors, one per row
       o_ref  : (Bp, 128)      lane-padded prediction output
    """

    def W(e):   # (fin, fout) weight matrix carved out of the packed slab
        return w_ref[e["off"]:e["off"] + e["fin"], 0:e["fout"]]

    def V(e):   # (1, fout) bias / gain / beta row
        return v_ref[e["row"]:e["row"] + 1, 0:e["fout"]]

    def dot(a, b):
        # f32 on purpose: the kernel is dispatch/DMA bound and the MXU is <1%
        # utilized; bf16 would only add casts + drift (perf-review guidance).
        return jnp.dot(a, b, preferred_element_type=jnp.float32)

    def layernorm(y, g_e, b_e):
        # One-pass LN: two INDEPENDENT reductions (E[y], E[y^2]) instead of a
        # serialized centered second pass; var = E[y^2] - mean^2.
        mu = jnp.mean(y, axis=-1, keepdims=True)
        m2 = jnp.mean(y * y, axis=-1, keepdims=True)
        var = m2 - mu * mu
        return (y - mu) * jax.lax.rsqrt(var + LN_EPS) * V(g_e) + V(b_e)

    def gelu(y):
        # TODO(synk): torch nn.GELU() default is erf-based; tanh approximation
        # used for guaranteed Mosaic lowering (~1e-3 delta).
        return jax.nn.gelu(y, approximate=True)

    inp = inp_ref[...]
    x = inp[:, 0:noise_dim]
    beta = inp[:, noise_dim:noise_dim + 1]
    ctx = inp[:, ctx_off:ctx_off + hidden]

    # shared_ctx_mlp over [beta, sin(beta), cos(beta), context]:
    # time features computed in-kernel (EUP sin/cos) and applied as broadcast
    # mul-adds -> no wrapper concat, no extra DMA, no K=3 MXU pass.
    sc = layout["shared_ctx"]
    ctx_emb = (dot(ctx, W(sc["w_c"])) + V(sc["b"])
               + beta * V(sc["w_t"][0])
               + jnp.sin(beta) * V(sc["w_t"][1])
               + jnp.cos(beta) * V(sc["w_t"][2]))

    def transaoa(lp, xin):
        # TODO(synk): TransAoA definition not provided; stand-in is a single
        # Linear over [x | ctx_emb] (row-split dot, no concat) + LayerNorm + GELU.
        y = dot(xin, W(lp["w_x"])) + dot(ctx_emb, W(lp["w_c"])) + V(lp["b"])
        return gelu(layernorm(y, lp["g"], lp["be"]))

    def mid_triangle(mp, input_up, input_down):
        u = dot(input_up, W(mp["w_mid"])) + V(mp["b_mid"])
        u = gelu(layernorm(u, mp["g_mid"], mp["be_mid"]))
        # mid_dropout: identity (eval mode)
        input_down.append(u)            # mirrors torch's in-place list mutation
        # cat(input_down) @ W1  ==  sum_k node_k @ W1_k  (row-split weights)
        acc = V(mp["b1"])
        for node, w_e in zip(input_down, mp["w1"]):
            acc = acc + dot(node, W(w_e))
        xm = gelu(layernorm(acc, mp["g1"], mp["be1"]))
        # mid_dropout: identity (eval mode)
        # seq-len-1 MultiheadAttention: softmax over a single key == 1, hence
        # attn_output = out_proj(v_proj(xm)).
        v = dot(xm, W(mp["wv"])) + V(mp["bv"])
        attn = dot(v, W(mp["wo"])) + V(mp["bo"])
        return attn + u

    # ----- UNet++ wiring (static Python control flow; L is static) ---------
    up_outputs = []
    cur = x
    for i in range(L + 1):
        cur = transaoa(layout["up_layers"][i], cur)
        up_outputs.append(cur)

    inputs = []
    for j in range(L):
        cur = mid_triangle(layout["down_mid"][j], up_outputs[j + 1],
                           [up_outputs[j]])
        dl = layout["down"][j]
        cur = dot(cur, W(dl["w"])) + V(dl["b"])
        inputs.append([up_outputs[j], cur])

    key = L
    for j in range(L - 1, 0, -1):
        for i in range(j):
            cur = mid_triangle(layout["down_mid"][key], inputs[i + 1][-1],
                               inputs[i])
            dl = layout["down"][i]
            cur = dot(cur, W(dl["w"])) + V(dl["b"])
            inputs[i][-1] = cur
            key += 1

    # Prediction head (weights lane-padded to 128 -> dense, unmasked store).
    pp = layout["prediction"]
    o_ref[...] = dot(inputs[0][-1], W(pp["w"])) + V(pp["b"])


# ----------------------------------------------------------------------------
# Parameter construction + packing into two lane-128 slabs
# ----------------------------------------------------------------------------
class _KeyGen:
    def __init__(self, seed=0):
        self._key = jax.random.PRNGKey(seed)

    def __call__(self):
        self._key, k = jax.random.split(self._key)
        return k


def build_packed_params(seed, noise_dim, hidden, filters, L):
    """Builds deterministic synthetic weights and packs them into two slabs.

    Returns (w_slab, v_slab, layout); layout is a nested dict/list of STATIC
    offsets the kernel uses to carve slices out of the slabs.
    """
    gen = _KeyGen(seed)
    w_blocks, v_rows = [], []
    state = {"w_off": 0}

    def pack_matrix(w):
        fin, fout = w.shape
        fin_p = _ceil_to(fin, SUBLANE)          # 8-row aligned block starts
        blk = jnp.zeros((fin_p, LANE), jnp.float32).at[:fin, :fout].set(w)
        off = state["w_off"]
        w_blocks.append(blk)
        state["w_off"] += fin_p
        return {"off": off, "fin": fin, "fout": fout}

    def pack_vector(v):
        fout = v.shape[0]
        row = len(v_rows)
        v_rows.append(jnp.zeros((LANE,), jnp.float32).at[:fout].set(v))
        return {"row": row, "fout": fout}

    def rand_linear(fin, fout):
        w = jax.random.normal(gen(), (fin, fout), jnp.float32) / math.sqrt(fin)
        b = 0.01 * jax.random.normal(gen(), (fout,), jnp.float32)
        return w, b

    def ln_vectors(fout):
        return (pack_vector(jnp.ones((fout,), jnp.float32)),
                pack_vector(jnp.zeros((fout,), jnp.float32)))

    layout = {}

    # shared_ctx_mlp: Linear(hidden+3 -> hidden); the 3 time-feature rows are
    # stored as single vectors (used as broadcast mul-adds in the kernel).
    # TODO(synk): MLP definition not provided; stand-in is a single Linear.
    w, b = rand_linear(hidden + 3, hidden)
    layout["shared_ctx"] = {
        "w_t": [pack_vector(w[k]) for k in range(3)],
        "w_c": pack_matrix(w[3:]),
        "b": pack_vector(b),
    }

    # prediction head: Linear(filters[0] -> noise_dim); fout widened to the
    # full 128-lane slab width so the final store is lane-dense.
    w, b = rand_linear(filters[0], noise_dim)
    pw, pb = pack_matrix(w), pack_vector(b)
    layout["prediction"] = {"w": {**pw, "fout": LANE}, "b": {**pb, "fout": LANE}}

    # up_layers (TransAoA stand-ins): weight rows pre-split [x(in) | ctx].
    ups = []
    for i in range(L + 1):
        fin = noise_dim if i == 0 else filters[i - 1]
        w, b = rand_linear(fin + hidden, filters[i])
        g, be = ln_vectors(filters[i])
        ups.append({"w_x": pack_matrix(w[:fin]), "w_c": pack_matrix(w[fin:]),
                    "b": pack_vector(b), "g": g, "be": be})
    layout["up_layers"] = ups

    # down_mid_layers (MidTriangle1): mid_linear1 stored as one contiguous
    # block; pieces addressed by row offset (fout multiples -> sublane aligned).
    mids = []
    for j in range(1, L + 1):
        for i in range(0, L - j + 1):
            fin, fout, n = filters[i + 1], filters[i], j + 1
            w_mid, b_mid = rand_linear(fin, fout)
            g_mid, be_mid = ln_vectors(fout)
            w1, b1 = rand_linear(fout * n, fout)
            w1_base = pack_matrix(w1)
            w1_pieces = [{"off": w1_base["off"] + k * fout,
                          "fin": fout, "fout": fout} for k in range(n)]
            g1, be1 = ln_vectors(fout)
            wv, bv = rand_linear(fout, fout)   # V-proj of MultiheadAttention
            wo, bo = rand_linear(fout, fout)   # out_proj of MultiheadAttention
            mids.append({"w_mid": pack_matrix(w_mid), "b_mid": pack_vector(b_mid),
                         "g_mid": g_mid, "be_mid": be_mid,
                         "w1": w1_pieces, "b1": pack_vector(b1),
                         "g1": g1, "be1": be1,
                         "wv": pack_matrix(wv), "bv": pack_vector(bv),
                         "wo": pack_matrix(wo), "bo": pack_vector(bo)})
    layout["down_mid"] = mids

    # down_layers (MLP stand-ins): Linear(filters[i] -> filters[i]).
    downs = []
    for i in range(L):
        w, b = rand_linear(filters[i], filters[i])
        downs.append({"w": pack_matrix(w), "b": pack_vector(b)})
    layout["down"] = downs

    w_slab = jnp.concatenate(w_blocks, axis=0)
    n_pad = _ceil_to(len(v_rows), SUBLANE) - len(v_rows)
    v_slab = jnp.stack(v_rows + [jnp.zeros((LANE,), jnp.float32)] * n_pad, axis=0)
    return w_slab, v_slab, layout


# ----------------------------------------------------------------------------
# Forward wrapper: one fused pallas_call, 3 input DMAs total
# ----------------------------------------------------------------------------
def make_forward(layout, *, L, noise_dim, hidden):
    ctx_off = _ceil_to(noise_dim + 1, SUBLANE)
    in_width = _ceil_to(ctx_off + hidden, LANE)
    kernel = functools.partial(_fused_forward_kernel, layout, L, noise_dim,
                               hidden, ctx_off)
    vmem = pl.BlockSpec(memory_space=pltpu.MemorySpace.VMEM)

    # TODO(synk): if filters/hidden/L grow, re-derive the VMEM budget (v7x has
    # 64 MiB physical / 32 MiB default scoped) and set
    # pltpu.CompilerParams(vmem_limit_bytes=...); only once Bp >= 16 add a
    # 'parallel' batch grid axis to use v7x's second TensorCore.
    @jax.jit
    def forward(w_slab, v_slab, x, beta, context):
        B = x.shape[0]
        Bp = max(SUBLANE, _ceil_to(B, SUBLANE))
        # Pack x | beta | context into ONE lane-dense input slab (single DMA);
        # sin/cos of beta are computed inside the kernel on the EUP.
        inp = jnp.zeros((Bp, in_width), jnp.float32)
        inp = inp.at[:B, 0:noise_dim].set(x)
        inp = inp.at[:B, noise_dim].set(beta.reshape(B))
        inp = inp.at[:B, ctx_off:ctx_off + hidden].set(context.reshape(B, hidden))

        out = pl.pallas_call(
            kernel,
            out_shape=jax.ShapeDtypeStruct((Bp, LANE), jnp.float32),
            in_specs=[vmem, vmem, vmem],
            out_specs=vmem,
        )(inp, w_slab, v_slab)
        return out[:B, :noise_dim]

    return forward


# ----------------------------------------------------------------------------
# Main
# ----------------------------------------------------------------------------
if __name__ == "__main__":
    NOISE_DIM = 4
    HIDDEN = 32
    FILTERS = [16, 32, 64]
    L = 2
    B = 2

    w_slab, v_slab, layout = build_packed_params(
        seed=0, noise_dim=NOISE_DIM, hidden=HIDDEN, filters=FILTERS, L=L)
    forward = make_forward(layout, L=L, noise_dim=NOISE_DIM, hidden=HIDDEN)

    key = jax.random.PRNGKey(0)
    kx, kb, kc = jax.random.split(key, 3)
    x = jax.random.normal(kx, (B, NOISE_DIM), jnp.float32)
    beta = jax.random.uniform(kb, (B,), jnp.float32)
    context = jax.random.normal(kc, (B, HIDDEN), jnp.float32)

    out = forward(w_slab, v_slab, x, beta, context)
    out = jax.block_until_ready(out)
    assert out.shape == (B, NOISE_DIM), out.shape
    assert bool(jnp.all(jnp.isfinite(out)))
    print("KERNEL_OK")
</pallas_src>

<mosaic_0001>
module attributes {stable_mosaic.version = 11 : i64} {
  func.func @_fused_forward_kernel(%arg0: memref<8x128xf32, #tpu.memory_space<vmem>>, %arg1: memref<648x128xf32, #tpu.memory_space<vmem>>, %arg2: memref<40x128xf32, #tpu.memory_space<vmem>>, %arg3: memref<8x128xf32, #tpu.memory_space<vmem>>) attributes {dimension_semantics = [], scalar_prefetch = 0 : i64, scratch_operands = 0 : i64, tpu.core_type = #tpu.core_type<tc>} {
    %c0 = arith.constant 0 : index
    %c0_0 = arith.constant 0 : index
    %0 = vector.load %arg0[%c0, %c0_0] : memref<8x128xf32, #tpu.memory_space<vmem>>, vector<8x128xf32>
    %1 = vector.extract_strided_slice %0 {offsets = [0, 0], sizes = [8, 4], strides = [1, 1]} : vector<8x128xf32> to vector<8x4xf32>
    %2 = vector.extract_strided_slice %0 {offsets = [0, 4], sizes = [8, 1], strides = [1, 1]} : vector<8x128xf32> to vector<8x1xf32>
    %3 = vector.extract_strided_slice %0 {offsets = [0, 8], sizes = [8, 32], strides = [1, 1]} : vector<8x128xf32> to vector<8x32xf32>
    %c0_1 = arith.constant 0 : index
    %c0_2 = arith.constant 0 : index
    %4 = vector.load %arg1[%c0_1, %c0_2] : memref<648x128xf32, #tpu.memory_space<vmem>>, vector<32x32xf32>
    %cst = arith.constant dense<0.000000e+00> : vector<8x32xf32>
    %5 = tpu.matmul %3, %4, %cst {dimension_numbers = #tpu.dot_dimension_numbers<[1], [0], [0], [1], [0, 0, 1, 1], [], []>} : vector<8x32xf32>, vector<32x32xf32>, vector<8x32xf32> -> vector<8x32xf32>
    %c3 = arith.constant 3 : index
    %c0_3 = arith.constant 0 : index
    %6 = vector.load %arg2[%c3, %c0_3] : memref<40x128xf32, #tpu.memory_space<vmem>>, vector<1x32xf32>
    %7 = vector.broadcast %6 : vector<1x32xf32> to vector<8x32xf32>
    %8 = arith.addf %5, %7 : vector<8x32xf32>
    %c0_4 = arith.constant 0 : index
    %c0_5 = arith.constant 0 : index
    %9 = vector.load %arg2[%c0_4, %c0_5] : memref<40x128xf32, #tpu.memory_space<vmem>>, vector<1x32xf32>
    %10 = vector.broadcast %2 : vector<8x1xf32> to vector<8x32xf32>
    %11 = vector.broadcast %9 : vector<1x32xf32> to vector<8x32xf32>
    %12 = arith.mulf %10, %11 : vector<8x32xf32>
    %13 = arith.addf %8, %12 : vector<8x32xf32>
    %14 = math.sin %2 : vector<8x1xf32>
    %c1 = arith.constant 1 : index
    %c0_6 = arith.constant 0 : index
    %15 = vector.load %arg2[%c1, %c0_6] : memref<40x128xf32, #tpu.memory_space<vmem>>, vector<1x32xf32>
    %16 = vector.broadcast %14 : vector<8x1xf32> to vector<8x32xf32>
    %17 = vector.broadcast %15 : vector<1x32xf32> to vector<8x32xf32>
    %18 = arith.mulf %16, %17 : vector<8x32xf32>
    %19 = arith.addf %13, %18 : vector<8x32xf32>
    %20 = math.cos %2 : vector<8x1xf32>
    %c2 = arith.constant 2 : index
    %c0_7 = arith.constant 0 : index
    %21 = vector.load %arg2[%c2, %c0_7] : memref<40x128xf32, #tpu.memory_space<vmem>>, vector<1x32xf32>
    %22 = vector.broadcast %20 : vector<8x1xf32> to vector<8x32xf32>
    %23 = vector.broadcast %21 : vector<1x32xf32> to vector<8x32xf32>
    %24 = arith.mulf %22, %23 : vector<8x32xf32>
    %25 = arith.addf %19, %24 : vector<8x32xf32>
    %c48 = arith.constant 48 : index
    %c0_8 = arith.constant 0 : index
    %26 = vector.load %arg1[%c48, %c0_8] : memref<648x128xf32, #tpu.memory_space<vmem>>, vector<4x16xf32>
    %cst_9 = arith.constant dense<0.000000e+00> : vector<8x16xf32>
    %27 = tpu.matmul %1, %26, %cst_9 {dimension_numbers = #tpu.dot_dimension_numbers<[1], [0], [0], [1], [0, 0, 1, 1], [], []>} : vector<8x4xf32>, vector<4x16xf32>, vector<8x16xf32> -> vector<8x16xf32>
    %c56 = arith.constant 56 : index
    %c0_10 = arith.constant 0 : index
    %28 = vector.load %arg1[%c56, %c0_10] : memref<648x128xf32, #tpu.memory_space<vmem>>, vector<32x16xf32>
    %cst_11 = arith.constant dense<0.000000e+00> : vector<8x16xf32>
    %29 = tpu.matmul %25, %28, %cst_11 {dimension_numbers = #tpu.dot_dimension_numbers<[1], [0], [0], [1], [0, 0, 1, 1], [], []>} : vector<8x32xf32>, vector<32x16xf32>, vector<8x16xf32> -> vector<8x16xf32>
    %30 = arith.addf %27, %29 : vector<8x16xf32>
    %c7 = arith.constant 7 : index
    %c0_12 = arith.constant 0 : index
    %31 = vector.load %arg2[%c7, %c0_12] : memref<40x128xf32, #tpu.memory_space<vmem>>, vector<1x16xf32>
    %32 = vector.broadcast %31 : vector<1x16xf32> to vector<8x16xf32>
    %33 = arith.addf %30, %32 : vector<8x16xf32>
    %cst_13 = arith.constant dense<0.000000e+00> : vector<8xf32>
    %34 = vector.multi_reduction <add>, %33, %cst_13 [1] : vector<8x16xf32> to vector<8xf32>
    %35 = vector.shape_cast %34 : vector<8xf32> to vector<8x1xf32>
    %cst_14 = arith.constant 1.600000e+01 : f32
    %36 = vector.broadcast %cst_14 : f32 to vector<8x1xf32>
    %37 = arith.divf %35, %36 : vector<8x1xf32>
    %38 = arith.mulf %33, %33 : vector<8x16xf32>
    %cst_15 = arith.constant dense<0.000000e+00> : vector<8xf32>
    %39 = vector.multi_reduction <add>, %38, %cst_15 [1] : vector<8x16xf32> to vector<8xf32>
    %40 = vector.shape_cast %39 : vector<8xf32> to vector<8x1xf32>
    %cst_16 = arith.constant 1.600000e+01 : f32
    %41 = vector.broadcast %cst_16 : f32 to vector<8x1xf32>
    %42 = arith.divf %40, %41 : vector<8x1xf32>
    %43 = arith.mulf %37, %37 : vector<8x1xf32>
    %44 = arith.subf %42, %43 : vector<8x1xf32>
    %45 = vector.broadcast %37 : vector<8x1xf32> to vector<8x16xf32>
    %46 = arith.subf %33, %45 : vector<8x16xf32>
    %cst_17 = arith.constant 9.99999974E-6 : f32
    %47 = vector.broadcast %cst_17 : f32 to vector<8x1xf32>
    %48 = arith.addf %44, %47 : vector<8x1xf32>
    %49 = math.rsqrt %48 : vector<8x1xf32>
    %50 = vector.broadcast %49 : vector<8x1xf32> to vector<8x16xf32>
    %51 = arith.mulf %46, %50 : vector<8x16xf32>
    %c5 = arith.constant 5 : index
    %c0_18 = arith.constant 0 : index
    %52 = vector.load %arg2[%c5, %c0_18] : memref<40x128xf32, #tpu.memory_space<vmem>>, vector<1x16xf32>
    %53 = vector.broadcast %52 : vector<1x16xf32> to vector<8x16xf32>
    %54 = arith.mulf %51, %53 : vector<8x16xf32>
    %c6 = arith.constant 6 : index
    %c0_19 = arith.constant 0 : index
    %55 = vector.load %arg2[%c6, %c0_19] : memref<40x128xf32, #tpu.memory_space<vmem>>, vector<1x16xf32>
    %56 = vector.broadcast %55 : vector<1x16xf32> to vector<8x16xf32>
    %57 = arith.addf %54, %56 : vector<8x16xf32>
    %58 = arith.mulf %57, %57 : vector<8x16xf32>
    %59 = arith.mulf %57, %58 : vector<8x16xf32>
    %cst_20 = arith.constant 4.471500e-02 : f32
    %60 = vector.broadcast %cst_20 : f32 to vector<8x16xf32>
    %61 = arith.mulf %60, %59 : vector<8x16xf32>
    %62 = arith.addf %57, %61 : vector<8x16xf32>
    %cst_21 = arith.constant 0.797884583 : f32
    %63 = vector.broadcast %cst_21 : f32 to vector<8x16xf32>
    %64 = arith.mulf %63, %62 : vector<8x16xf32>
    %65 = math.tanh %64 : vector<8x16xf32>
    %cst_22 = arith.constant 1.000000e+00 : f32
    %66 = vector.broadcast %cst_22 : f32 to vector<8x16xf32>
    %67 = arith.addf %66, %65 : vector<8x16xf32>
    %cst_23 = arith.constant 5.000000e-01 : f32
    %68 = vector.broadcast %cst_23 : f32 to vector<8x16xf32>
    %69 = arith.mulf %68, %67 : vector<8x16xf32>
    %70 = arith.mulf %57, %69 : vector<8x16xf32>
    %c88 = arith.constant 88 : index
    %c0_24 = arith.constant 0 : index
    %71 = vector.load %arg1[%c88, %c0_24] : memref<648x128xf32, #tpu.memory_space<vmem>>, vector<16x32xf32>
    %cst_25 = arith.constant dense<0.000000e+00> : vector<8x32xf32>
    %72 = tpu.matmul %70, %71, %cst_25 {dimension_numbers = #tpu.dot_dimension_numbers<[1], [0], [0], [1], [0, 0, 1, 1], [], []>} : vector<8x16xf32>, vector<16x32xf32>, vector<8x32xf32> -> vector<8x32xf32>
    %c104 = arith.constant 104 : index
    %c0_26 = arith.constant 0 : index
    %73 = vector.load %arg1[%c104, %c0_26] : memref<648x128xf32, #tpu.memory_space<vmem>>, vector<32x32xf32>
    %cst_27 = arith.constant dense<0.000000e+00> : vector<8x32xf32>
    %74 = tpu.matmul %25, %73, %cst_27 {dimension_numbers = #tpu.dot_dimension_numbers<[1], [0], [0], [1], [0, 0, 1, 1], [], []>} : vector<8x32xf32>, vector<32x32xf32>, vector<8x32xf32> -> vector<8x32xf32>
    %75 = arith.addf %72, %74 : vector<8x32xf32>
    %c10 = arith.constant 10 : index
    %c0_28 = arith.constant 0 : index
    %76 = vector.load %arg2[%c10, %c0_28] : memref<40x128xf32, #tpu.memory_space<vmem>>, vector<1x32xf32>
    %77 = vector.broadcast %76 : vector<1x32xf32> to vector<8x32xf32>
    %78 = arith.addf %75, %77 : vector<8x32xf32>
    %cst_29 = arith.constant dense<0.000000e+00> : vector<8xf32>
    %79 = vector.multi_reduction <add>, %78, %cst_29 [1] : vector<8x32xf32> to vector<8xf32>
    %80 = vector.shape_cast %79 : vector<8xf32> to vector<8x1xf32>
    %cst_30 = arith.constant 3.200000e+01 : f32
    %81 = vector.broadcast %cst_30 : f32 to vector<8x1xf32>
    %82 = arith.divf %80, %81 : vector<8x1xf32>
    %83 = arith.mulf %78, %78 : vector<8x32xf32>
    %cst_31 = arith.constant dense<0.000000e+00> : vector<8xf32>
    %84 = vector.multi_reduction <add>, %83, %cst_31 [1] : vector<8x32xf32> to vector<8xf32>
    %85 = vector.shape_cast %84 : vector<8xf32> to vector<8x1xf32>
    %cst_32 = arith.constant 3.200000e+01 : f32
    %86 = vector.broadcast %cst_32 : f32 to vector<8x1xf32>
    %87 = arith.divf %85, %86 : vector<8x1xf32>
    %88 = arith.mulf %82, %82 : vector<8x1xf32>
    %89 = arith.subf %87, %88 : vector<8x1xf32>
    %90 = vector.broadcast %82 : vector<8x1xf32> to vector<8x32xf32>
    %91 = arith.subf %78, %90 : vector<8x32xf32>
    %cst_33 = arith.constant 9.99999974E-6 : f32
    %92 = vector.broadcast %cst_33 : f32 to vector<8x1xf32>
    %93 = arith.addf %89, %92 : vector<8x1xf32>
    %94 = math.rsqrt %93 : vector<8x1xf32>
    %95 = vector.broadcast %94 : vector<8x1xf32> to vector<8x32xf32>
    %96 = arith.mulf %91, %95 : vector<8x32xf32>
    %c8 = arith.constant 8 : index
    %c0_34 = arith.constant 0 : index
    %97 = vector.load %arg2[%c8, %c0_34] : memref<40x128xf32, #tpu.memory_space<vmem>>, vector<1x32xf32>
    %98 = vector.broadcast %97 : vector<1x32xf32> to vector<8x32xf32>
    %99 = arith.mulf %96, %98 : vector<8x32xf32>
    %c9 = arith.constant 9 : index
    %c0_35 = arith.constant 0 : index
    %100 = vector.load %arg2[%c9, %c0_35] : memref<40x128xf32, #tpu.memory_space<vmem>>, vector<1x32xf32>
    %101 = vector.broadcast %100 : vector<1x32xf32> to vector<8x32xf32>
    %102 = arith.addf %99, %101 : vector<8x32xf32>
    %103 = arith.mulf %102, %102 : vector<8x32xf32>
    %104 = arith.mulf %102, %103 : vector<8x32xf32>
    %cst_36 = arith.constant 4.471500e-02 : f32
    %105 = vector.broadcast %cst_36 : f32 to vector<8x32xf32>
    %106 = arith.mulf %105, %104 : vector<8x32xf32>
    %107 = arith.addf %102, %106 : vector<8x32xf32>
    %cst_37 = arith.constant 0.797884583 : f32
    %108 = vector.broadcast %cst_37 : f32 to vector<8x32xf32>
    %109 = arith.mulf %108, %107 : vector<8x32xf32>
    %110 = math.tanh %109 : vector<8x32xf32>
    %cst_38 = arith.constant 1.000000e+00 : f32
    %111 = vector.broadcast %cst_38 : f32 to vector<8x32xf32>
    %112 = arith.addf %111, %110 : vector<8x32xf32>
    %cst_39 = arith.constant 5.000000e-01 : f32
    %113 = vector.broadcast %cst_39 : f32 to vector<8x32xf32>
    %114 = arith.mulf %113, %112 : vector<8x32xf32>
    %115 = arith.mulf %102, %114 : vector<8x32xf32>
    %c136 = arith.constant 136 : index
    %c0_40 = arith.constant 0 : index
    %116 = vector.load %arg1[%c136, %c0_40] : memref<648x128xf32, #tpu.memory_space<vmem>>, vector<32x64xf32>
    %cst_41 = arith.constant dense<0.000000e+00> : vector<8x64xf32>
    %117 = tpu.matmul %115, %116, %cst_41 {dimension_numbers = #tpu.dot_dimension_numbers<[1], [0], [0], [1], [0, 0, 1, 1], [], []>} : vector<8x32xf32>, vector<32x64xf32>, vector<8x64xf32> -> vector<8x64xf32>
    %c168 = arith.constant 168 : index
    %c0_42 = arith.constant 0 : index
    %118 = vector.load %arg1[%c168, %c0_42] : memref<648x128xf32, #tpu.memory_space<vmem>>, vector<32x64xf32>
    %cst_43 = arith.constant dense<0.000000e+00> : vector<8x64xf32>
    %119 = tpu.matmul %25, %118, %cst_43 {dimension_numbers = #tpu.dot_dimension_numbers<[1], [0], [0], [1], [0, 0, 1, 1], [], []>} : vector<8x32xf32>, vector<32x64xf32>, vector<8x64xf32> -> vector<8x64xf32>
    %120 = arith.addf %117, %119 : vector<8x64xf32>
    %c13 = arith.constant 13 : index
    %c0_44 = arith.constant 0 : index
    %121 = vector.load %arg2[%c13, %c0_44] : memref<40x128xf32, #tpu.memory_space<vmem>>, vector<1x64xf32>
    %122 = vector.broadcast %121 : vector<1x64xf32> to vector<8x64xf32>
    %123 = arith.addf %120, %122 : vector<8x64xf32>
    %cst_45 = arith.constant dense<0.000000e+00> : vector<8xf32>
    %124 = vector.multi_reduction <add>, %123, %cst_45 [1] : vector<8x64xf32> to vector<8xf32>
    %125 = vector.shape_cast %124 : vector<8xf32> to vector<8x1xf32>
    %cst_46 = arith.constant 6.400000e+01 : f32
    %126 = vector.broadcast %cst_46 : f32 to vector<8x1xf32>
    %127 = arith.divf %125, %126 : vector<8x1xf32>
    %128 = arith.mulf %123, %123 : vector<8x64xf32>
    %cst_47 = arith.constant dense<0.000000e+00> : vector<8xf32>
    %129 = vector.multi_reduction <add>, %128, %cst_47 [1] : vector<8x64xf32> to vector<8xf32>
    %130 = vector.shape_cast %129 : vector<8xf32> to vector<8x1xf32>
    %cst_48 = arith.constant 6.400000e+01 : f32
    %131 = vector.broadcast %cst_48 : f32 to vector<8x1xf32>
    %132 = arith.divf %130, %131 : vector<8x1xf32>
    %133 = arith.mulf %127, %127 : vector<8x1xf32>
    %134 = arith.subf %132, %133 : vector<8x1xf32>
    %135 = vector.broadcast %127 : vector<8x1xf32> to vector<8x64xf32>
    %136 = arith.subf %123, %135 : vector<8x64xf32>
    %cst_49 = arith.constant 9.99999974E-6 : f32
    %137 = vector.broadcast %cst_49 : f32 to vector<8x1xf32>
    %138 = arith.addf %134, %137 : vector<8x1xf32>
    %139 = math.rsqrt %138 : vector<8x1xf32>
    %140 = vector.broadcast %139 : vector<8x1xf32> to vector<8x64xf32>
    %141 = arith.mulf %136, %140 : vector<8x64xf32>
    %c11 = arith.constant 11 : index
    %c0_50 = arith.constant 0 : index
    %142 = vector.load %arg2[%c11, %c0_50] : memref<40x128xf32, #tpu.memory_space<vmem>>, vector<1x64xf32>
    %143 = vector.broadcast %142 : vector<1x64xf32> to vector<8x64xf32>
    %144 = arith.mulf %141, %143 : vector<8x64xf32>
    %c12 = arith.constant 12 : index
    %c0_51 = arith.constant 0 : index
    %145 = vector.load %arg2[%c12, %c0_51] : memref<40x128xf32, #tpu.memory_space<vmem>>, vector<1x64xf32>
    %146 = vector.broadcast %145 : vector<1x64xf32> to vector<8x64xf32>
    %147 = arith.addf %144, %146 : vector<8x64xf32>
    %148 = arith.mulf %147, %147 : vector<8x64xf32>
    %149 = arith.mulf %147, %148 : vector<8x64xf32>
    %cst_52 = arith.constant 4.471500e-02 : f32
    %150 = vector.broadcast %cst_52 : f32 to vector<8x64xf32>
    %151 = arith.mulf %150, %149 : vector<8x64xf32>
    %152 = arith.addf %147, %151 : vector<8x64xf32>
    %cst_53 = arith.constant 0.797884583 : f32
    %153 = vector.broadcast %cst_53 : f32 to vector<8x64xf32>
    %154 = arith.mulf %153, %152 : vector<8x64xf32>
    %155 = math.tanh %154 : vector<8x64xf32>
    %cst_54 = arith.constant 1.000000e+00 : f32
    %156 = vector.broadcast %cst_54 : f32 to vector<8x64xf32>
    %157 = arith.addf %156, %155 : vector<8x64xf32>
    %cst_55 = arith.constant 5.000000e-01 : f32
    %158 = vector.broadcast %cst_55 : f32 to vector<8x64xf32>
    %159 = arith.mulf %158, %157 : vector<8x64xf32>
    %160 = arith.mulf %147, %159 : vector<8x64xf32>
    %c232 = arith.constant 232 : index
    %c0_56 = arith.constant 0 : index
    %161 = vector.load %arg1[%c232, %c0_56] : memref<648x128xf32, #tpu.memory_space<vmem>>, vector<32x16xf32>
    %cst_57 = arith.constant dense<0.000000e+00> : vector<8x16xf32>
    %162 = tpu.matmul %115, %161, %cst_57 {dimension_numbers = #tpu.dot_dimension_numbers<[1], [0], [0], [1], [0, 0, 1, 1], [], []>} : vector<8x32xf32>, vector<32x16xf32>, vector<8x16xf32> -> vector<8x16xf32>
    %c18 = arith.constant 18 : index
    %c0_58 = arith.constant 0 : index
    %163 = vector.load %arg2[%c18, %c0_58] : memref<40x128xf32, #tpu.memory_space<vmem>>, vector<1x16xf32>
    %164 = vector.broadcast %163 : vector<1x16xf32> to vector<8x16xf32>
    %165 = arith.addf %162, %164 : vector<8x16xf32>
    %cst_59 = arith.constant dense<0.000000e+00> : vector<8xf32>
    %166 = vector.multi_reduction <add>, %165, %cst_59 [1] : vector<8x16xf32> to vector<8xf32>
    %167 = vector.shape_cast %166 : vector<8xf32> to vector<8x1xf32>
    %cst_60 = arith.constant 1.600000e+01 : f32
    %168 = vector.broadcast %cst_60 : f32 to vector<8x1xf32>
    %169 = arith.divf %167, %168 : vector<8x1xf32>
    %170 = arith.mulf %165, %165 : vector<8x16xf32>
    %cst_61 = arith.constant dense<0.000000e+00> : vector<8xf32>
    %171 = vector.multi_reduction <add>, %170, %cst_61 [1] : vector<8x16xf32> to vector<8xf32>
    %172 = vector.shape_cast %171 : vector<8xf32> to vector<8x1xf32>
    %cst_62 = arith.constant 1.600000e+01 : f32
    %173 = vector.broadcast %cst_62 : f32 to vector<8x1xf32>
    %174 = arith.divf %172, %173 : vector<8x1xf32>
    %175 = arith.mulf %169, %169 : vector<8x1xf32>
    %176 = arith.subf %174, %175 : vector<8x1xf32>
    %177 = vector.broadcast %169 : vector<8x1xf32> to vector<8x16xf32>
    %178 = arith.subf %165, %177 : vector<8x16xf32>
    %cst_63 = arith.constant 9.99999974E-6 : f32
    %179 = vector.broadcast %cst_63 : f32 to vector<8x1xf32>
    %180 = arith.addf %176, %179 : vector<8x1xf32>
    %181 = math.rsqrt %180 : vector<8x1xf32>
    %182 = vector.broadcast %181 : vector<8x1xf32> to vector<8x16xf32>
    %183 = arith.mulf %178, %182 : vector<8x16xf32>
    %c14 = arith.constant 14 : index
    %c0_64 = arith.constant 0 : index
    %184 = vector.load %arg2[%c14, %c0_64] : memref<40x128xf32, #tpu.memory_space<vmem>>, vector<1x16xf32>
    %185 = vector.broadcast %184 : vector<1x16xf32> to vector<8x16xf32>
    %186 = arith.mulf %183, %185 : vector<8x16xf32>
    %c15 = arith.constant 15 : index
    %c0_65 = arith.constant 0 : index
    %187 = vector.load %arg2[%c15, %c0_65] : memref<40x128xf32, #tpu.memory_space<vmem>>, vector<1x16xf32>
    %188 = vector.broadcast %187 : vector<1x16xf32> to vector<8x16xf32>
    %189 = arith.addf %186, %188 : vector<8x16xf32>
    %190 = arith.mulf %189, %189 : vector<8x16xf32>
    %191 = arith.mulf %189, %190 : vector<8x16xf32>
    %cst_66 = arith.constant 4.471500e-02 : f32
    %192 = vector.broadcast %cst_66 : f32 to vector<8x16xf32>
    %193 = arith.mulf %192, %191 : vector<8x16xf32>
    %194 = arith.addf %189, %193 : vector<8x16xf32>
    %cst_67 = arith.constant 0.797884583 : f32
    %195 = vector.broadcast %cst_67 : f32 to vector<8x16xf32>
    %196 = arith.mulf %195, %194 : vector<8x16xf32>
    %197 = math.tanh %196 : vector<8x16xf32>
    %cst_68 = arith.constant 1.000000e+00 : f32
    %198 = vector.broadcast %cst_68 : f32 to vector<8x16xf32>
    %199 = arith.addf %198, %197 : vector<8x16xf32>
    %cst_69 = arith.constant 5.000000e-01 : f32
    %200 = vector.broadcast %cst_69 : f32 to vector<8x16xf32>
    %201 = arith.mulf %200, %199 : vector<8x16xf32>
    %202 = arith.mulf %189, %201 : vector<8x16xf32>
    %c19 = arith.constant 19 : index
    %c0_70 = arith.constant 0 : index
    %203 = vector.load %arg2[%c19, %c0_70] : memref<40x128xf32, #tpu.memory_space<vmem>>, vector<1x16xf32>
    %c200 = arith.constant 200 : index
    %c0_71 = arith.constant 0 : index
    %204 = vector.load %arg1[%c200, %c0_71] : memref<648x128xf32, #tpu.memory_space<vmem>>, vector<16x16xf32>
    %cst_72 = arith.constant dense<0.000000e+00> : vector<8x16xf32>
    %205 = tpu.matmul %70, %204, %cst_72 {dimension_numbers = #tpu.dot_dimension_numbers<[1], [0], [0], [1], [0, 0, 1, 1], [], []>} : vector<8x16xf32>, vector<16x16xf32>, vector<8x16xf32> -> vector<8x16xf32>
    %206 = vector.broadcast %203 : vector<1x16xf32> to vector<8x16xf32>
    %207 = arith.addf %206, %205 : vector<8x16xf32>
    %c216 = arith.constant 216 : index
    %c0_73 = arith.constant 0 : index
    %208 = vector.load %arg1[%c216, %c0_73] : memref<648x128xf32, #tpu.memory_space<vmem>>, vector<16x16xf32>
    %cst_74 = arith.constant dense<0.000000e+00> : vector<8x16xf32>
    %209 = tpu.matmul %202, %208, %cst_74 {dimension_numbers = #tpu.dot_dimension_numbers<[1], [0], [0], [1], [0, 0, 1, 1], [], []>} : vector<8x16xf32>, vector<16x16xf32>, vector<8x16xf32> -> vector<8x16xf32>
    %210 = arith.addf %207, %209 : vector<8x16xf32>
    %cst_75 = arith.constant dense<0.000000e+00> : vector<8xf32>
    %211 = vector.multi_reduction <add>, %210, %cst_75 [1] : vector<8x16xf32> to vector<8xf32>
    %212 = vector.shape_cast %211 : vector<8xf32> to vector<8x1xf32>
    %cst_76 = arith.constant 1.600000e+01 : f32
    %213 = vector.broadcast %cst_76 : f32 to vector<8x1xf32>
    %214 = arith.divf %212, %213 : vector<8x1xf32>
    %215 = arith.mulf %210, %210 : vector<8x16xf32>
    %cst_77 = arith.constant dense<0.000000e+00> : vector<8xf32>
    %216 = vector.multi_reduction <add>, %215, %cst_77 [1] : vector<8x16xf32> to vector<8xf32>
    %217 = vector.shape_cast %216 : vector<8xf32> to vector<8x1xf32>
    %cst_78 = arith.constant 1.600000e+01 : f32
    %218 = vector.broadcast %cst_78 : f32 to vector<8x1xf32>
    %219 = arith.divf %217, %218 : vector<8x1xf32>
    %220 = arith.mulf %214, %214 : vector<8x1xf32>
    %221 = arith.subf %219, %220 : vector<8x1xf32>
    %222 = vector.broadcast %214 : vector<8x1xf32> to vector<8x16xf32>
    %223 = arith.subf %210, %222 : vector<8x16xf32>
    %cst_79 = arith.constant 9.99999974E-6 : f32
    %224 = vector.broadcast %cst_79 : f32 to vector<8x1xf32>
    %225 = arith.addf %221, %224 : vector<8x1xf32>
    %226 = math.rsqrt %225 : vector<8x1xf32>
    %227 = vector.broadcast %226 : vector<8x1xf32> to vector<8x16xf32>
    %228 = arith.mulf %223, %227 : vector<8x16xf32>
    %c16 = arith.constant 16 : index
    %c0_80 = arith.constant 0 : index
    %229 = vector.load %arg2[%c16, %c0_80] : memref<40x128xf32, #tpu.memory_space<vmem>>, vector<1x16xf32>
    %230 = vector.broadcast %229 : vector<1x16xf32> to vector<8x16xf32>
    %231 = arith.mulf %228, %230 : vector<8x16xf32>
    %c17 = arith.constant 17 : index
    %c0_81 = arith.constant 0 : index
    %232 = vector.load %arg2[%c17, %c0_81] : memref<40x128xf32, #tpu.memory_space<vmem>>, vector<1x16xf32>
    %233 = vector.broadcast %232 : vector<1x16xf32> to vector<8x16xf32>
    %234 = arith.addf %231, %233 : vector<8x16xf32>
    %235 = arith.mulf %234, %234 : vector<8x16xf32>
    %236 = arith.mulf %234, %235 : vector<8x16xf32>
    %cst_82 = arith.constant 4.471500e-02 : f32
    %237 = vector.broadcast %cst_82 : f32 to vector<8x16xf32>
    %238 = arith.mulf %237, %236 : vector<8x16xf32>
    %239 = arith.addf %234, %238 : vector<8x16xf32>
    %cst_83 = arith.constant 0.797884583 : f32
    %240 = vector.broadcast %cst_83 : f32 to vector<8x16xf32>
    %241 = arith.mulf %240, %239 : vector<8x16xf32>
    %242 = math.tanh %241 : vector<8x16xf32>
    %cst_84 = arith.constant 1.000000e+00 : f32
    %243 = vector.broadcast %cst_84 : f32 to vector<8x16xf32>
    %244 = arith.addf %243, %242 : vector<8x16xf32>
    %cst_85 = arith.constant 5.000000e-01 : f32
    %245 = vector.broadcast %cst_85 : f32 to vector<8x16xf32>
    %246 = arith.mulf %245, %244 : vector<8x16xf32>
    %247 = arith.mulf %234, %246 : vector<8x16xf32>
    %c264 = arith.constant 264 : index
    %c0_86 = arith.constant 0 : index
    %248 = vector.load %arg1[%c264, %c0_86] : memref<648x128xf32, #tpu.memory_space<vmem>>, vector<16x16xf32>
    %cst_87 = arith.constant dense<0.000000e+00> : vector<8x16xf32>
    %249 = tpu.matmul %247, %248, %cst_87 {dimension_numbers = #tpu.dot_dimension_numbers<[1], [0], [0], [1], [0, 0, 1, 1], [], []>} : vector<8x16xf32>, vector<16x16xf32>, vector<8x16xf32> -> vector<8x16xf32>
    %c20 = arith.constant 20 : index
    %c0_88 = arith.constant 0 : index
    %250 = vector.load %arg2[%c20, %c0_88] : memref<40x128xf32, #tpu.memory_space<vmem>>, vector<1x16xf32>
    %251 = vector.broadcast %250 : vector<1x16xf32> to vector<8x16xf32>
    %252 = arith.addf %249, %251 : vector<8x16xf32>
    %c280 = arith.constant 280 : index
    %c0_89 = arith.constant 0 : index
    %253 = vector.load %arg1[%c280, %c0_89] : memref<648x128xf32, #tpu.memory_space<vmem>>, vector<16x16xf32>
    %cst_90 = arith.constant dense<0.000000e+00> : vector<8x16xf32>
    %254 = tpu.matmul %252, %253, %cst_90 {dimension_numbers = #tpu.dot_dimension_numbers<[1], [0], [0], [1], [0, 0, 1, 1], [], []>} : vector<8x16xf32>, vector<16x16xf32>, vector<8x16xf32> -> vector<8x16xf32>
    %c21 = arith.constant 21 : index
    %c0_91 = arith.constant 0 : index
    %255 = vector.load %arg2[%c21, %c0_91] : memref<40x128xf32, #tpu.memory_space<vmem>>, vector<1x16xf32>
    %256 = vector.broadcast %255 : vector<1x16xf32> to vector<8x16xf32>
    %257 = arith.addf %254, %256 : vector<8x16xf32>
    %258 = arith.addf %257, %202 : vector<8x16xf32>
    %c600 = arith.constant 600 : index
    %c0_92 = arith.constant 0 : index
    %259 = vector.load %arg1[%c600, %c0_92] : memref<648x128xf32, #tpu.memory_space<vmem>>, vector<16x16xf32>
    %cst_93 = arith.constant dense<0.000000e+00> : vector<8x16xf32>
    %260 = tpu.matmul %258, %259, %cst_93 {dimension_numbers = #tpu.dot_dimension_numbers<[1], [0], [0], [1], [0, 0, 1, 1], [], []>} : vector<8x16xf32>, vector<16x16xf32>, vector<8x16xf32> -> vector<8x16xf32>
    %c38 = arith.constant 38 : index
    %c0_94 = arith.constant 0 : index
    %261 = vector.load %arg2[%c38, %c0_94] : memref<40x128xf32, #tpu.memory_space<vmem>>, vector<1x16xf32>
    %262 = vector.broadcast %261 : vector<1x16xf32> to vector<8x16xf32>
    %263 = arith.addf %260, %262 : vector<8x16xf32>
    %c360 = arith.constant 360 : index
    %c0_95 = arith.constant 0 : index
    %264 = vector.load %arg1[%c360, %c0_95] : memref<648x128xf32, #tpu.memory_space<vmem>>, vector<64x32xf32>
    %cst_96 = arith.constant dense<0.000000e+00> : vector<8x32xf32>
    %265 = tpu.matmul %160, %264, %cst_96 {dimension_numbers = #tpu.dot_dimension_numbers<[1], [0], [0], [1], [0, 0, 1, 1], [], []>} : vector<8x64xf32>, vector<64x32xf32>, vector<8x32xf32> -> vector<8x32xf32>
    %c26 = arith.constant 26 : index
    %c0_97 = arith.constant 0 : index
    %266 = vector.load %arg2[%c26, %c0_97] : memref<40x128xf32, #tpu.memory_space<vmem>>, vector<1x32xf32>
    %267 = vector.broadcast %266 : vector<1x32xf32> to vector<8x32xf32>
    %268 = arith.addf %265, %267 : vector<8x32xf32>
    %cst_98 = arith.constant dense<0.000000e+00> : vector<8xf32>
    %269 = vector.multi_reduction <add>, %268, %cst_98 [1] : vector<8x32xf32> to vector<8xf32>
    %270 = vector.shape_cast %269 : vector<8xf32> to vector<8x1xf32>
    %cst_99 = arith.constant 3.200000e+01 : f32
    %271 = vector.broadcast %cst_99 : f32 to vector<8x1xf32>
    %272 = arith.divf %270, %271 : vector<8x1xf32>
    %273 = arith.mulf %268, %268 : vector<8x32xf32>
    %cst_100 = arith.constant dense<0.000000e+00> : vector<8xf32>
    %274 = vector.multi_reduction <add>, %273, %cst_100 [1] : vector<8x32xf32> to vector<8xf32>
    %275 = vector.shape_cast %274 : vector<8xf32> to vector<8x1xf32>
    %cst_101 = arith.constant 3.200000e+01 : f32
    %276 = vector.broadcast %cst_101 : f32 to vector<8x1xf32>
    %277 = arith.divf %275, %276 : vector<8x1xf32>
    %278 = arith.mulf %272, %272 : vector<8x1xf32>
    %279 = arith.subf %277, %278 : vector<8x1xf32>
    %280 = vector.broadcast %272 : vector<8x1xf32> to vector<8x32xf32>
    %281 = arith.subf %268, %280 : vector<8x32xf32>
    %cst_102 = arith.constant 9.99999974E-6 : f32
    %282 = vector.broadcast %cst_102 : f32 to vector<8x1xf32>
    %283 = arith.addf %279, %282 : vector<8x1xf32>
    %284 = math.rsqrt %283 : vector<8x1xf32>
    %285 = vector.broadcast %284 : vector<8x1xf32> to vector<8x32xf32>
    %286 = arith.mulf %281, %285 : vector<8x32xf32>
    %c22 = arith.constant 22 : index
    %c0_103 = arith.constant 0 : index
    %287 = vector.load %arg2[%c22, %c0_103] : memref<40x128xf32, #tpu.memory_space<vmem>>, vector<1x32xf32>
    %288 = vector.broadcast %287 : vector<1x32xf32> to vector<8x32xf32>
    %289 = arith.mulf %286, %288 : vector<8x32xf32>
    %c23 = arith.constant 23 : index
    %c0_104 = arith.constant 0 : index
    %290 = vector.load %arg2[%c23, %c0_104] : memref<40x128xf32, #tpu.memory_space<vmem>>, vector<1x32xf32>
    %291 = vector.broadcast %290 : vector<1x32xf32> to vector<8x32xf32>
    %292 = arith.addf %289, %291 : vector<8x32xf32>
    %293 = arith.mulf %292, %292 : vector<8x32xf32>
    %294 = arith.mulf %292, %293 : vector<8x32xf32>
    %cst_105 = arith.constant 4.471500e-02 : f32
    %295 = vector.broadcast %cst_105 : f32 to vector<8x32xf32>
    %296 = arith.mulf %295, %294 : vector<8x32xf32>
    %297 = arith.addf %292, %296 : vector<8x32xf32>
    %cst_106 = arith.constant 0.797884583 : f32
    %298 = vector.broadcast %cst_106 : f32 to vector<8x32xf32>
    %299 = arith.mulf %298, %297 : vector<8x32xf32>
    %300 = math.tanh %299 : vector<8x32xf32>
    %cst_107 = arith.constant 1.000000e+00 : f32
    %301 = vector.broadcast %cst_107 : f32 to vector<8x32xf32>
    %302 = arith.addf %301, %300 : vector<8x32xf32>
    %cst_108 = arith.constant 5.000000e-01 : f32
    %303 = vector.broadcast %cst_108 : f32 to vector<8x32xf32>
    %304 = arith.mulf %303, %302 : vector<8x32xf32>
    %305 = arith.mulf %292, %304 : vector<8x32xf32>
    %c27 = arith.constant 27 : index
    %c0_109 = arith.constant 0 : index
    %306 = vector.load %arg2[%c27, %c0_109] : memref<40x128xf32, #tpu.memory_space<vmem>>, vector<1x32xf32>
    %c296 = arith.constant 296 : index
    %c0_110 = arith.constant 0 : index
    %307 = vector.load %arg1[%c296, %c0_110] : memref<648x128xf32, #tpu.memory_space<vmem>>, vector<32x32xf32>
    %cst_111 = arith.constant dense<0.000000e+00> : vector<8x32xf32>
    %308 = tpu.matmul %115, %307, %cst_111 {dimension_numbers = #tpu.dot_dimension_numbers<[1], [0], [0], [1], [0, 0, 1, 1], [], []>} : vector<8x32xf32>, vector<32x32xf32>, vector<8x32xf32> -> vector<8x32xf32>
    %309 = vector.broadcast %306 : vector<1x32xf32> to vector<8x32xf32>
    %310 = arith.addf %309, %308 : vector<8x32xf32>
    %c328 = arith.constant 328 : index
    %c0_112 = arith.constant 0 : index
    %311 = vector.load %arg1[%c328, %c0_112] : memref<648x128xf32, #tpu.memory_space<vmem>>, vector<32x32xf32>
    %cst_113 = arith.constant dense<0.000000e+00> : vector<8x32xf32>
    %312 = tpu.matmul %305, %311, %cst_113 {dimension_numbers = #tpu.dot_dimension_numbers<[1], [0], [0], [1], [0, 0, 1, 1], [], []>} : vector<8x32xf32>, vector<32x32xf32>, vector<8x32xf32> -> vector<8x32xf32>
    %313 = arith.addf %310, %312 : vector<8x32xf32>
    %cst_114 = arith.constant dense<0.000000e+00> : vector<8xf32>
    %314 = vector.multi_reduction <add>, %313, %cst_114 [1] : vector<8x32xf32> to vector<8xf32>
    %315 = vector.shape_cast %314 : vector<8xf32> to vector<8x1xf32>
    %cst_115 = arith.constant 3.200000e+01 : f32
    %316 = vector.broadcast %cst_115 : f32 to vector<8x1xf32>
    %317 = arith.divf %315, %316 : vector<8x1xf32>
    %318 = arith.mulf %313, %313 : vector<8x32xf32>
    %cst_116 = arith.constant dense<0.000000e+00> : vector<8xf32>
    %319 = vector.multi_reduction <add>, %318, %cst_116 [1] : vector<8x32xf32> to vector<8xf32>
    %320 = vector.shape_cast %319 : vector<8xf32> to vector<8x1xf32>
    %cst_117 = arith.constant 3.200000e+01 : f32
    %321 = vector.broadcast %cst_117 : f32 to vector<8x1xf32>
    %322 = arith.divf %320, %321 : vector<8x1xf32>
    %323 = arith.mulf %317, %317 : vector<8x1xf32>
    %324 = arith.subf %322, %323 : vector<8x1xf32>
    %325 = vector.broadcast %317 : vector<8x1xf32> to vector<8x32xf32>
    %326 = arith.subf %313, %325 : vector<8x32xf32>
    %cst_118 = arith.constant 9.99999974E-6 : f32
    %327 = vector.broadcast %cst_118 : f32 to vector<8x1xf32>
    %328 = arith.addf %324, %327 : vector<8x1xf32>
    %329 = math.rsqrt %328 : vector<8x1xf32>
    %330 = vector.broadcast %329 : vector<8x1xf32> to vector<8x32xf32>
    %331 = arith.mulf %326, %330 : vector<8x32xf32>
    %c24 = arith.constant 24 : index
    %c0_119 = arith.constant 0 : index
    %332 = vector.load %arg2[%c24, %c0_119] : memref<40x128xf32, #tpu.memory_space<vmem>>, vector<1x32xf32>
    %333 = vector.broadcast %332 : vector<1x32xf32> to vector<8x32xf32>
    %334 = arith.mulf %331, %333 : vector<8x32xf32>
    %c25 = arith.constant 25 : index
    %c0_120 = arith.constant 0 : index
    %335 = vector.load %arg2[%c25, %c0_120] : memref<40x128xf32, #tpu.memory_space<vmem>>, vector<1x32xf32>
    %336 = vector.broadcast %335 : vector<1x32xf32> to vector<8x32xf32>
    %337 = arith.addf %334, %336 : vector<8x32xf32>
    %338 = arith.mulf %337, %337 : vector<8x32xf32>
    %339 = arith.mulf %337, %338 : vector<8x32xf32>
    %cst_121 = arith.constant 4.471500e-02 : f32
    %340 = vector.broadcast %cst_121 : f32 to vector<8x32xf32>
    %341 = arith.mulf %340, %339 : vector<8x32xf32>
    %342 = arith.addf %337, %341 : vector<8x32xf32>
    %cst_122 = arith.constant 0.797884583 : f32
    %343 = vector.broadcast %cst_122 : f32 to vector<8x32xf32>
    %344 = arith.mulf %343, %342 : vector<8x32xf32>
    %345 = math.tanh %344 : vector<8x32xf32>
    %cst_123 = arith.constant 1.000000e+00 : f32
    %346 = vector.broadcast %cst_123 : f32 to vector<8x32xf32>
    %347 = arith.addf %346, %345 : vector<8x32xf32>
    %cst_124 = arith.constant 5.000000e-01 : f32
    %348 = vector.broadcast %cst_124 : f32 to vector<8x32xf32>
    %349 = arith.mulf %348, %347 : vector<8x32xf32>
    %350 = arith.mulf %337, %349 : vector<8x32xf32>
    %c424 = arith.constant 424 : index
    %c0_125 = arith.constant 0 : index
    %351 = vector.load %arg1[%c424, %c0_125] : memref<648x128xf32, #tpu.memory_space<vmem>>, vector<32x32xf32>
    %cst_126 = arith.constant dense<0.000000e+00> : vector<8x32xf32>
    %352 = tpu.matmul %350, %351, %cst_126 {dimension_numbers = #tpu.dot_dimension_numbers<[1], [0], [0], [1], [0, 0, 1, 1], [], []>} : vector<8x32xf32>, vector<32x32xf32>, vector<8x32xf32> -> vector<8x32xf32>
    %c28 = arith.constant 28 : index
    %c0_127 = arith.constant 0 : index
    %353 = vector.load %arg2[%c28, %c0_127] : memref<40x128xf32, #tpu.memory_space<vmem>>, vector<1x32xf32>
    %354 = vector.broadcast %353 : vector<1x32xf32> to vector<8x32xf32>
    %355 = arith.addf %352, %354 : vector<8x32xf32>
    %c456 = arith.constant 456 : index
    %c0_128 = arith.constant 0 : index
    %356 = vector.load %arg1[%c456, %c0_128] : memref<648x128xf32, #tpu.memory_space<vmem>>, vector<32x32xf32>
    %cst_129 = arith.constant dense<0.000000e+00> : vector<8x32xf32>
    %357 = tpu.matmul %355, %356, %cst_129 {dimension_numbers = #tpu.dot_dimension_numbers<[1], [0], [0], [1], [0, 0, 1, 1], [], []>} : vector<8x32xf32>, vector<32x32xf32>, vector<8x32xf32> -> vector<8x32xf32>
    %c29 = arith.constant 29 : index
    %c0_130 = arith.constant 0 : index
    %358 = vector.load %arg2[%c29, %c0_130] : memref<40x128xf32, #tpu.memory_space<vmem>>, vector<1x32xf32>
    %359 = vector.broadcast %358 : vector<1x32xf32> to vector<8x32xf32>
    %360 = arith.addf %357, %359 : vector<8x32xf32>
    %361 = arith.addf %360, %305 : vector<8x32xf32>
    %c616 = arith.constant 616 : index
    %c0_131 = arith.constant 0 : index
    %362 = vector.load %arg1[%c616, %c0_131] : memref<648x128xf32, #tpu.memory_space<vmem>>, vector<32x32xf32>
    %cst_132 = arith.constant dense<0.000000e+00> : vector<8x32xf32>
    %363 = tpu.matmul %361, %362, %cst_132 {dimension_numbers = #tpu.dot_dimension_numbers<[1], [0], [0], [1], [0, 0, 1, 1], [], []>} : vector<8x32xf32>, vector<32x32xf32>, vector<8x32xf32> -> vector<8x32xf32>
    %c39 = arith.constant 39 : index
    %c0_133 = arith.constant 0 : index
    %364 = vector.load %arg2[%c39, %c0_133] : memref<40x128xf32, #tpu.memory_space<vmem>>, vector<1x32xf32>
    %365 = vector.broadcast %364 : vector<1x32xf32> to vector<8x32xf32>
    %366 = arith.addf %363, %365 : vector<8x32xf32>
    %c536 = arith.constant 536 : index
    %c0_134 = arith.constant 0 : index
    %367 = vector.load %arg1[%c536, %c0_134] : memref<648x128xf32, #tpu.memory_space<vmem>>, vector<32x16xf32>
    %cst_135 = arith.constant dense<0.000000e+00> : vector<8x16xf32>
    %368 = tpu.matmul %366, %367, %cst_135 {dimension_numbers = #tpu.dot_dimension_numbers<[1], [0], [0], [1], [0, 0, 1, 1], [], []>} : vector<8x32xf32>, vector<32x16xf32>, vector<8x16xf32> -> vector<8x16xf32>
    %c34 = arith.constant 34 : index
    %c0_136 = arith.constant 0 : index
    %369 = vector.load %arg2[%c34, %c0_136] : memref<40x128xf32, #tpu.memory_space<vmem>>, vector<1x16xf32>
    %370 = vector.broadcast %369 : vector<1x16xf32> to vector<8x16xf32>
    %371 = arith.addf %368, %370 : vector<8x16xf32>
    %cst_137 = arith.constant dense<0.000000e+00> : vector<8xf32>
    %372 = vector.multi_reduction <add>, %371, %cst_137 [1] : vector<8x16xf32> to vector<8xf32>
    %373 = vector.shape_cast %372 : vector<8xf32> to vector<8x1xf32>
    %cst_138 = arith.constant 1.600000e+01 : f32
    %374 = vector.broadcast %cst_138 : f32 to vector<8x1xf32>
    %375 = arith.divf %373, %374 : vector<8x1xf32>
    %376 = arith.mulf %371, %371 : vector<8x16xf32>
    %cst_139 = arith.constant dense<0.000000e+00> : vector<8xf32>
    %377 = vector.multi_reduction <add>, %376, %cst_139 [1] : vector<8x16xf32> to vector<8xf32>
    %378 = vector.shape_cast %377 : vector<8xf32> to vector<8x1xf32>
    %cst_140 = arith.constant 1.600000e+01 : f32
    %379 = vector.broadcast %cst_140 : f32 to vector<8x1xf32>
    %380 = arith.divf %378, %379 : vector<8x1xf32>
    %381 = arith.mulf %375, %375 : vector<8x1xf32>
    %382 = arith.subf %380, %381 : vector<8x1xf32>
    %383 = vector.broadcast %375 : vector<8x1xf32> to vector<8x16xf32>
    %384 = arith.subf %371, %383 : vector<8x16xf32>
    %cst_141 = arith.constant 9.99999974E-6 : f32
    %385 = vector.broadcast %cst_141 : f32 to vector<8x1xf32>
    %386 = arith.addf %382, %385 : vector<8x1xf32>
    %387 = math.rsqrt %386 : vector<8x1xf32>
    %388 = vector.broadcast %387 : vector<8x1xf32> to vector<8x16xf32>
    %389 = arith.mulf %384, %388 : vector<8x16xf32>
    %c30 = arith.constant 30 : index
    %c0_142 = arith.constant 0 : index
    %390 = vector.load %arg2[%c30, %c0_142] : memref<40x128xf32, #tpu.memory_space<vmem>>, vector<1x16xf32>
    %391 = vector.broadcast %390 : vector<1x16xf32> to vector<8x16xf32>
    %392 = arith.mulf %389, %391 : vector<8x16xf32>
    %c31 = arith.constant 31 : index
    %c0_143 = arith.constant 0 : index
    %393 = vector.load %arg2[%c31, %c0_143] : memref<40x128xf32, #tpu.memory_space<vmem>>, vector<1x16xf32>
    %394 = vector.broadcast %393 : vector<1x16xf32> to vector<8x16xf32>
    %395 = arith.addf %392, %394 : vector<8x16xf32>
    %396 = arith.mulf %395, %395 : vector<8x16xf32>
    %397 = arith.mulf %395, %396 : vector<8x16xf32>
    %cst_144 = arith.constant 4.471500e-02 : f32
    %398 = vector.broadcast %cst_144 : f32 to vector<8x16xf32>
    %399 = arith.mulf %398, %397 : vector<8x16xf32>
    %400 = arith.addf %395, %399 : vector<8x16xf32>
    %cst_145 = arith.constant 0.797884583 : f32
    %401 = vector.broadcast %cst_145 : f32 to vector<8x16xf32>
    %402 = arith.mulf %401, %400 : vector<8x16xf32>
    %403 = math.tanh %402 : vector<8x16xf32>
    %cst_146 = arith.constant 1.000000e+00 : f32
    %404 = vector.broadcast %cst_146 : f32 to vector<8x16xf32>
    %405 = arith.addf %404, %403 : vector<8x16xf32>
    %cst_147 = arith.constant 5.000000e-01 : f32
    %406 = vector.broadcast %cst_147 : f32 to vector<8x16xf32>
    %407 = arith.mulf %406, %405 : vector<8x16xf32>
    %408 = arith.mulf %395, %407 : vector<8x16xf32>
    %c35 = arith.constant 35 : index
    %c0_148 = arith.constant 0 : index
    %409 = vector.load %arg2[%c35, %c0_148] : memref<40x128xf32, #tpu.memory_space<vmem>>, vector<1x16xf32>
    %c488 = arith.constant 488 : index
    %c0_149 = arith.constant 0 : index
    %410 = vector.load %arg1[%c488, %c0_149] : memref<648x128xf32, #tpu.memory_space<vmem>>, vector<16x16xf32>
    %cst_150 = arith.constant dense<0.000000e+00> : vector<8x16xf32>
    %411 = tpu.matmul %70, %410, %cst_150 {dimension_numbers = #tpu.dot_dimension_numbers<[1], [0], [0], [1], [0, 0, 1, 1], [], []>} : vector<8x16xf32>, vector<16x16xf32>, vector<8x16xf32> -> vector<8x16xf32>
    %412 = vector.broadcast %409 : vector<1x16xf32> to vector<8x16xf32>
    %413 = arith.addf %412, %411 : vector<8x16xf32>
    %c504 = arith.constant 504 : index
    %c0_151 = arith.constant 0 : index
    %414 = vector.load %arg1[%c504, %c0_151] : memref<648x128xf32, #tpu.memory_space<vmem>>, vector<16x16xf32>
    %cst_152 = arith.constant dense<0.000000e+00> : vector<8x16xf32>
    %415 = tpu.matmul %263, %414, %cst_152 {dimension_numbers = #tpu.dot_dimension_numbers<[1], [0], [0], [1], [0, 0, 1, 1], [], []>} : vector<8x16xf32>, vector<16x16xf32>, vector<8x16xf32> -> vector<8x16xf32>
    %416 = arith.addf %413, %415 : vector<8x16xf32>
    %c520 = arith.constant 520 : index
    %c0_153 = arith.constant 0 : index
    %417 = vector.load %arg1[%c520, %c0_153] : memref<648x128xf32, #tpu.memory_space<vmem>>, vector<16x16xf32>
    %cst_154 = arith.constant dense<0.000000e+00> : vector<8x16xf32>
    %418 = tpu.matmul %408, %417, %cst_154 {dimension_numbers = #tpu.dot_dimension_numbers<[1], [0], [0], [1], [0, 0, 1, 1], [], []>} : vector<8x16xf32>, vector<16x16xf32>, vector<8x16xf32> -> vector<8x16xf32>
    %419 = arith.addf %416, %418 : vector<8x16xf32>
    %cst_155 = arith.constant dense<0.000000e+00> : vector<8xf32>
    %420 = vector.multi_reduction <add>, %419, %cst_155 [1] : vector<8x16xf32> to vector<8xf32>
    %421 = vector.shape_cast %420 : vector<8xf32> to vector<8x1xf32>
    %cst_156 = arith.constant 1.600000e+01 : f32
    %422 = vector.broadcast %cst_156 : f32 to vector<8x1xf32>
    %423 = arith.divf %421, %422 : vector<8x1xf32>
    %424 = arith.mulf %419, %419 : vector<8x16xf32>
    %cst_157 = arith.constant dense<0.000000e+00> : vector<8xf32>
    %425 = vector.multi_reduction <add>, %424, %cst_157 [1] : vector<8x16xf32> to vector<8xf32>
    %426 = vector.shape_cast %425 : vector<8xf32> to vector<8x1xf32>
    %cst_158 = arith.constant 1.600000e+01 : f32
    %427 = vector.broadcast %cst_158 : f32 to vector<8x1xf32>
    %428 = arith.divf %426, %427 : vector<8x1xf32>
    %429 = arith.mulf %423, %423 : vector<8x1xf32>
    %430 = arith.subf %428, %429 : vector<8x1xf32>
    %431 = vector.broadcast %423 : vector<8x1xf32> to vector<8x16xf32>
    %432 = arith.subf %419, %431 : vector<8x16xf32>
    %cst_159 = arith.constant 9.99999974E-6 : f32
    %433 = vector.broadcast %cst_159 : f32 to vector<8x1xf32>
    %434 = arith.addf %430, %433 : vector<8x1xf32>
    %435 = math.rsqrt %434 : vector<8x1xf32>
    %436 = vector.broadcast %435 : vector<8x1xf32> to vector<8x16xf32>
    %437 = arith.mulf %432, %436 : vector<8x16xf32>
    %c32 = arith.constant 32 : index
    %c0_160 = arith.constant 0 : index
    %438 = vector.load %arg2[%c32, %c0_160] : memref<40x128xf32, #tpu.memory_space<vmem>>, vector<1x16xf32>
    %439 = vector.broadcast %438 : vector<1x16xf32> to vector<8x16xf32>
    %440 = arith.mulf %437, %439 : vector<8x16xf32>
    %c33 = arith.constant 33 : index
    %c0_161 = arith.constant 0 : index
    %441 = vector.load %arg2[%c33, %c0_161] : memref<40x128xf32, #tpu.memory_space<vmem>>, vector<1x16xf32>
    %442 = vector.broadcast %441 : vector<1x16xf32> to vector<8x16xf32>
    %443 = arith.addf %440, %442 : vector<8x16xf32>
    %444 = arith.mulf %443, %443 : vector<8x16xf32>
    %445 = arith.mulf %443, %444 : vector<8x16xf32>
    %cst_162 = arith.constant 4.471500e-02 : f32
    %446 = vector.broadcast %cst_162 : f32 to vector<8x16xf32>
    %447 = arith.mulf %446, %445 : vector<8x16xf32>
    %448 = arith.addf %443, %447 : vector<8x16xf32>
    %cst_163 = arith.constant 0.797884583 : f32
    %449 = vector.broadcast %cst_163 : f32 to vector<8x16xf32>
    %450 = arith.mulf %449, %448 : vector<8x16xf32>
    %451 = math.tanh %450 : vector<8x16xf32>
    %cst_164 = arith.constant 1.000000e+00 : f32
    %452 = vector.broadcast %cst_164 : f32 to vector<8x16xf32>
    %453 = arith.addf %452, %451 : vector<8x16xf32>
    %cst_165 = arith.constant 5.000000e-01 : f32
    %454 = vector.broadcast %cst_165 : f32 to vector<8x16xf32>
    %455 = arith.mulf %454, %453 : vector<8x16xf32>
    %456 = arith.mulf %443, %455 : vector<8x16xf32>
    %c568 = arith.constant 568 : index
    %c0_166 = arith.constant 0 : index
    %457 = vector.load %arg1[%c568, %c0_166] : memref<648x128xf32, #tpu.memory_space<vmem>>, vector<16x16xf32>
    %cst_167 = arith.constant dense<0.000000e+00> : vector<8x16xf32>
    %458 = tpu.matmul %456, %457, %cst_167 {dimension_numbers = #tpu.dot_dimension_numbers<[1], [0], [0], [1], [0, 0, 1, 1], [], []>} : vector<8x16xf32>, vector<16x16xf32>, vector<8x16xf32> -> vector<8x16xf32>
    %c36 = arith.constant 36 : index
    %c0_168 = arith.constant 0 : index
    %459 = vector.load %arg2[%c36, %c0_168] : memref<40x128xf32, #tpu.memory_space<vmem>>, vector<1x16xf32>
    %460 = vector.broadcast %459 : vector<1x16xf32> to vector<8x16xf32>
    %461 = arith.addf %458, %460 : vector<8x16xf32>
    %c584 = arith.constant 584 : index
    %c0_169 = arith.constant 0 : index
    %462 = vector.load %arg1[%c584, %c0_169] : memref<648x128xf32, #tpu.memory_space<vmem>>, vector<16x16xf32>
    %cst_170 = arith.constant dense<0.000000e+00> : vector<8x16xf32>
    %463 = tpu.matmul %461, %462, %cst_170 {dimension_numbers = #tpu.dot_dimension_numbers<[1], [0], [0], [1], [0, 0, 1, 1], [], []>} : vector<8x16xf32>, vector<16x16xf32>, vector<8x16xf32> -> vector<8x16xf32>
    %c37 = arith.constant 37 : index
    %c0_171 = arith.constant 0 : index
    %464 = vector.load %arg2[%c37, %c0_171] : memref<40x128xf32, #tpu.memory_space<vmem>>, vector<1x16xf32>
    %465 = vector.broadcast %464 : vector<1x16xf32> to vector<8x16xf32>
    %466 = arith.addf %463, %465 : vector<8x16xf32>
    %467 = arith.addf %466, %408 : vector<8x16xf32>
    %c600_172 = arith.constant 600 : index
    %c0_173 = arith.constant 0 : index
    %468 = vector.load %arg1[%c600_172, %c0_173] : memref<648x128xf32, #tpu.memory_space<vmem>>, vector<16x16xf32>
    %cst_174 = arith.constant dense<0.000000e+00> : vector<8x16xf32>
    %469 = tpu.matmul %467, %468, %cst_174 {dimension_numbers = #tpu.dot_dimension_numbers<[1], [0], [0], [1], [0, 0, 1, 1], [], []>} : vector<8x16xf32>, vector<16x16xf32>, vector<8x16xf32> -> vector<8x16xf32>
    %c38_175 = arith.constant 38 : index
    %c0_176 = arith.constant 0 : index
    %470 = vector.load %arg2[%c38_175, %c0_176] : memref<40x128xf32, #tpu.memory_space<vmem>>, vector<1x16xf32>
    %471 = vector.broadcast %470 : vector<1x16xf32> to vector<8x16xf32>
    %472 = arith.addf %469, %471 : vector<8x16xf32>
    %c32_177 = arith.constant 32 : index
    %c0_178 = arith.constant 0 : index
    %473 = vector.load %arg1[%c32_177, %c0_178] : memref<648x128xf32, #tpu.memory_space<vmem>>, vector<16x128xf32>
    %cst_179 = arith.constant dense<0.000000e+00> : vector<8x128xf32>
    %474 = tpu.matmul %472, %473, %cst_179 {dimension_numbers = #tpu.dot_dimension_numbers<[1], [0], [0], [1], [0, 0, 1, 1], [], []>} : vector<8x16xf32>, vector<16x128xf32>, vector<8x128xf32> -> vector<8x128xf32>
    %c4 = arith.constant 4 : index
    %c0_180 = arith.constant 0 : index
    %475 = vector.load %arg2[%c4, %c0_180] : memref<40x128xf32, #tpu.memory_space<vmem>>, vector<1x128xf32>
    %476 = vector.broadcast %475 : vector<1x128xf32> to vector<8x128xf32>
    %477 = arith.addf %474, %476 : vector<8x128xf32>
    %c0_181 = arith.constant 0 : index
    %c0_182 = arith.constant 0 : index
    %478 = vector.load %arg3[%c0_181, %c0_182] : memref<8x128xf32, #tpu.memory_space<vmem>>, vector<8x128xf32>
    tpu.vector_store %arg3[%c0_181, %c0_182], %477 {strides = array<i32>} : memref<8x128xf32, #tpu.memory_space<vmem>>, vector<8x128xf32>,
    return
  }
}

</mosaic_0001>

<bundles_post_ra>
// kernel: forward.1
= control target key start
LH: loop header
LB: loop body
LE: loop exit
PB: predicated region body
PF: predicated region fallthrough
CT: control target
= control target key end

     0   :  { %8 = vsyncpa [#allocation3], 0  ;;  %s1904_s0 = inlined_call_operand.vmem [shape: f32[8,128], index: 0, kind: input, shape index: {}]   ;;  %s1905_s1 = inlined_call_operand.hbm [shape: f32[648,128], index: 1, kind: input, shape index: {}]   ;;  %s1906_s2 = inlined_call_operand.hbm [shape: f32[40,128], index: 2, kind: input, shape index: {}]   ;;  %s1907_s3 = inlined_call_operand.vmem [shape: f32[8,128], index: 3, kind: output, shape index: {}]  }
   0x1   :  { %s16_s14 = sshll.u32 %s1905_s1, 4  ;;  %s17_s14 = int_to_ptr.hbm [resolvable:$true] %s16_s14 }
   0x2   :  { %9 = vsyncpa [#allocation5], 0  ;;  %s1691_s15 = smov [#allocation2]   ;;  %s29_s19 = sshll.u32 %s1906_s2, 4  ;;  %s30_s19 = int_to_ptr.hbm [resolvable:$true] %s29_s19 }
   0x3   :  { %s18_s16 = sshll.u32 %s1691_s15, 4  ;;  %s1692_s20 = smov 128   ;;  %s19_s16 = int_to_ptr.vmem [resolvable:$true] %s18_s16 }
   0x4   :  { %s1693_s21 = smov 8   ;;  %s1694_s22 = smov [#allocation4]  }
   0x5   :  { %24 = dma.hbm_to_vmem [thread:$0]  %s17_s14, 10368, %s19_s16, [#allocation3], %s1692_s20, %s1692_s20, %s1693_s21  }
   0x6   :  { %s31_s23 = sshll.u32 %s1694_s22, 4  ;;  %s32_s23 = int_to_ptr.vmem [resolvable:$true] %s31_s23 }
   0x7   :  { %37 = dma.hbm_to_vmem [thread:$0]  %s30_s19, 640, %s32_s23, [#allocation5], %s1692_s20, %s1692_s20, %s1693_s21  }
   0x8   :  { %1687 = dma.done.wait [#allocation3], 10368  }
   0x9   :  { %1688 = vsyncadd [#allocation3], 4294956928 }
   0xa   :  { %1689 = dma.done.wait [#allocation5], 640  }
   0xb   :  { %1690 = vsyncadd [#allocation5], 4294966656  ;;  %v1695_v0 = vmov 4   ;;  %v1736_v1 = vld [vmem:[%s1904_s0] sm:$0xff]  ;;  %v50_v2 = vld [vmem:[#allocation2 + $0x18] sm:$0xff]  ;;  %s1696_s2 = smov 120  }
   0xc   :  { %1556 = vset.pattern.permute.xlu1 %v1695_v0  ;;  %1555 = vset.pattern.permute.xlu0 %v1695_v0  ;;  %v49_v3 = vld [vmem:[#allocation2 + $0x10] sm:$0xff]  ;;  %v90_v4 = vand.u32 2139095040, %v1736_v1  ;;  %v48_v5 = vld [vmem:[#allocation2 + $0x8] sm:$0xff]  ;;  %v87_v6 = vand.u32 2147483647, %v1736_v1  ;;  %v47_v8 = vld [vmem:[#allocation2] sm:$0xff] }
   0xd   :  { %54 = vrot.lane.b32.xlu0 %v1736_v1, %s1696_s2  ;;  %71 = vmatpush.msra.mxu0 %v50_v2  ;;  %v1697_v19 = vmov 683565275   ;;  %v1698_v21 = vmov 2475754826   ;;  %v1699_v23 = vmov 2131351028  }
   0xe   :  { %v91_v7 = vshrl.u32 %v90_v4, 23  ;;  %v94_v9 = vand.u32 8388607, %v87_v6  ;;  %v1700_v25 = vmov 2102212464   ;;  %vm89_vm12 = vcmp.lt.s32.totalorder %v1736_v1, 0 }
   0xf   :  { %72 = vmatpush.msra.mxu0 %v49_v3  ;;  %v1701_v27 = vmov 920167782   ;;  %v1702_v34 = vmov 1326507024   ;;  %vm88_vm13 = vcmp.le.f32.partialorder %v87_v6, 0.7853982 }
  0x10   :  { %v1506_v10 = vadd.s32 4294967169, %v91_v7  ;;  %v95_v11 = vor.u32 8388608, %v94_v9  ;;  %v1703_v9 = vmov 0  }
  0x11   :  { %73 = vmatpush.msra.mxu0 %v48_v5 }
  0x12   :  { %v97_v12 = vadd.s32 1, %v1506_v10  ;;  %v1743_v13 = vshll.u32 %v95_v11, 8 }
  0x13   :  { %74 = vmatpush.msra.mxu0 %v47_v8 }
  0x14   :  { %vm98_vm0 = vcmp.gt.s32.totalorder %v97_v12, 0  ;;  %v136_v15 = vand.u32 65535, %v1743_v13  ;;  %v137_v29 = vshrl.u32 %v1743_v13, 16 }
  0x15   :  { %81 = vperm.xlu0 %1555, %v1736_v1   ;;  %v99_v14 = vsel %vm98_vm0, %v97_v12, 0 }
  0x16   :  { %v1747_v16 = vshrl.u32 %v99_v14, 5  ;;  %v101_v17 = vand.u32 31, %v99_v14 }
  0x18   :  { %v102_v18 = vsub.s32 32, %v101_v17  ;;  %v104_v20 = vshll.u32 %v1697_v19, %v101_v17  ;;  %v107_v22 = vshll.u32 %v1698_v21, %v101_v17  ;;  %v110_v24 = vshll.u32 %v1699_v23, %v101_v17 }
  0x19   :  { %v113_v26 = vshll.u32 %v1700_v25, %v101_v17  ;;  %v116_v28 = vshll.u32 %v1701_v27, %v101_v17  ;;  %vm119_vm1 = vcmp.lt.s32.totalorder %v1747_v16, 1  ;;  %vm120_vm2 = vcmp.lt.s32.totalorder %v1747_v16, 2 }
  0x1a   :  { %v105_v30 = vshrl.u32 %v1698_v21, %v102_v18  ;;  %v108_v31 = vshrl.u32 %v1699_v23, %v102_v18  ;;  %v111_v32 = vshrl.u32 %v1700_v25, %v102_v18  ;;  %v114_v33 = vshrl.u32 %v1701_v27, %v102_v18 }
  0x1b   :  { %v117_v35 = vshrl.u32 %v1702_v34, %v102_v18  ;;  %vm121_vm3 = vcmp.lt.s32.totalorder %v1747_v16, 3  ;;  %vm122_vm4 = vcmp.lt.s32.totalorder %v1747_v16, 4  ;;  %v103_v53 = vshrl.u32 %v1697_v19, %v102_v18 }
  0x1c   :  { %v106_v36 = vor.u32 %v105_v30, %v104_v20  ;;  %v109_v37 = vor.u32 %v108_v31, %v107_v22  ;;  %v112_v38 = vor.u32 %v111_v32, %v110_v24  ;;  %v115_v39 = vor.u32 %v114_v33, %v113_v26 }
  0x1d   :  { %v118_v40 = vor.u32 %v117_v35, %v116_v28 }
  0x1e   :  { %v127_v41 = vsel %vm119_vm1, %v106_v36, %v109_v37  ;;  %v128_v42 = vsel %vm122_vm4, %v115_v39, 920167782  ;;  %v131_v43 = vsel %vm119_vm1, %v109_v37, %v112_v38  ;;  %v124_v60 = vsel %vm122_vm4, %v112_v38, 2102212464 }
  0x1f   :  { %v129_v44 = vsel %vm121_vm3, %v112_v38, %v128_v42  ;;  %v132_v45 = vsel %vm122_vm4, %v118_v40, 1326507024  ;;  %v123_v4 = vsel %vm119_vm1, %v103_v53, %v106_v36  ;;  %v125_v7 = vsel %vm121_vm3, %v109_v37, %v124_v60 }
  0x20   :  { %v130_v46 = vsel %vm120_vm2, %v127_v41, %v129_v44  ;;  %v133_v47 = vsel %vm121_vm3, %v115_v39, %v132_v45  ;;  %v126_v24 = vsel %vm120_vm2, %v123_v4, %v125_v7  ;;  %vm230_vm1 = vweird.f32 %v1736_v1 }
  0x21   :  { %v134_v48 = vsel %vm120_vm2, %v131_v43, %v133_v47  ;;  %v160_v49 = vand.u32 65535, %v130_v46  ;;  %v161_v50 = vshrl.u32 %v130_v46, 16  ;;  %v180_v30 = vmul.u32 %v1743_v13, %v126_v24 }
  0x22   :  { %v138_v51 = vand.u32 65535, %v134_v48  ;;  %v139_v52 = vshrl.u32 %v134_v48, 16 }
  0x23   :  { %v162_v54 = vmul.u32 %v160_v49, %v136_v15  ;;  %v163_v55 = vmul.u32 %v161_v50, %v136_v15  ;;  %v164_v56 = vmul.u32 %v160_v49, %v137_v29  ;;  %v165_v61 = vmul.u32 %v161_v50, %v137_v29 }
  0x24   :  { %v140_v57 = vmul.u32 %v138_v51, %v136_v15  ;;  %v141_v58 = vmul.u32 %v139_v52, %v136_v15  ;;  %v142_v59 = vmul.u32 %v138_v51, %v137_v29  ;;  %v143_v0 = vmul.u32 %v139_v52, %v137_v29 }
  0x25   :  { %v166_v62 = vshll.u32 %v163_v55, 16  ;;  %v168_v63 = vshll.u32 %v164_v56, 16  ;;  %v167_v12 = vshrl.u32 %v163_v55, 16  ;;  %v169_v20 = vshrl.u32 %v164_v56, 16 }
  0x26   :  { %v144_v2 = vshll.u32 %v141_v58, 16  ;;  %v146_v3 = vshll.u32 %v142_v59, 16  ;;  %v145_v15 = vshrl.u32 %v141_v58, 16  ;;  %v147_v22 = vshrl.u32 %v142_v59, 16 }
  0x27   :  { %vm170_vm5 = vc.u32 %v162_v54, %v166_v62  ;;  %v172_v5 = vadd.s32 %v166_v62, %v162_v54 }
  0x28   :  { %vm148_vm6 = vc.u32 %v140_v57, %v144_v2  ;;  %v150_v8 = vadd.s32 %v144_v2, %v140_v57  ;;  %v171_v10 = vsel %vm170_vm5, 1, %v1703_v9  ;;  %vm56_vm5 = vcmask 261120  }
  0x29   :  { %v149_v11 = vsel %vm148_vm6, 1, %v1703_v9  ;;  %v173_v14 = vadd.s32 %v171_v10, %v165_v61  ;;  %vm174_vm7 = vc.u32 %v172_v5, %v168_v63  ;;  %v176_v27 = vadd.s32 %v172_v5, %v168_v63 }
  0x2a   :  { %v151_v17 = vadd.s32 %v149_v11, %v143_v0  ;;  %vm152_vm8 = vc.u32 %v150_v8, %v146_v3  ;;  %v175_v18 = vsel %vm174_vm7, 1, %v1703_v9  ;;  %vm445_vm6 = vcmask 1043456  }
  0x2b   :  { %v153_v19 = vsel %vm152_vm8, 1, %v1703_v9  ;;  %v177_v21 = vadd.s32 %v175_v18, %v173_v14  ;;  %vm442_vm7 = vcmask 31744   ;;  %vm472_vm8 = vcmask 130048  }
  0x2c   :  { %v155_v23 = vadd.s32 %v153_v19, %v151_v17 }
  0x2d   :  { %v178_v25 = vadd.s32 %v177_v21, %v167_v12 }
  0x2e   :  { %v156_v26 = vadd.s32 %v155_v23, %v145_v15 }
  0x2f   :  { %v179_v28 = vadd.s32 %v178_v25, %v169_v20 }
  0x30   :  { %v157_v29 = vadd.s32 %v156_v26, %v147_v22  ;;  %v418_v26 = vld [vmem:[#allocation2 + $0x50] sm:$0xff] }
  0x31   :  { %v183_v31 = vadd.s32 1, %v179_v28  ;;  %434 = vmatpush.msra.mxu1 %v418_v26  ;;  %v1563_v26 = vld [vmem:[#allocation4 + $0x6] ss:$0 sm:$0xff] }
  0x32   :  { %vm182_vm9 = vc.u32 %v157_v29, %v176_v27  ;;  %v181_v41 = vadd.s32 %v176_v27, %v157_v29  ;;  %v414_v27 = vld [vmem:[#allocation2 + $0x30] sm:$0xf]  ;;  %v624_v29 = vld [vmem:[#allocation2 + $0xc0] sm:$0xff] }
  0x33   :  { %v184_v32 = vsel %vm182_vm9, %v183_v31, %v179_v28  ;;  %v524_v28 = vld [vmem:[#allocation2 + $0x80] sm:$0xff]  ;;  %1513 = vmatpush.msk.msra.mxu2 %vm445_vm6, %v414_v27  ;;  %637 = vmatpush.msrb.mxu0 %v624_v29  ;;  %v523_v31 = vld [vmem:[#allocation2 + $0x78] sm:$0xff] }
  0x34   :  { %v185_v33 = vadd.s32 %v184_v32, %v180_v30  ;;  %537 = vmatpush.msra.mxu3 %v524_v28  ;;  %v417_v30 = vld [vmem:[#allocation2 + $0x48] sm:$0xff]  ;;  %v623_v32 = vld [vmem:[#allocation2 + $0xb8] sm:$0xff]  ;;  %1514 = vmatmul.msk.f32.vlgmr.msra.gmra.mxu2 %vm442_vm7, %v1736_v1 }
  0x35   :  { %435 = vmatpush.msra.mxu1 %v417_v30  ;;  %638 = vmatpush.msrb.mxu0 %v623_v32 }
  0x36   :  { %v186_v34 = vadd.s32 536870912, %v185_v33  ;;  %538 = vmatpush.msra.mxu3 %v523_v31 }
  0x38   :  { %v187_v35 = vshrl.u32 %v186_v34, 30  ;;  %v522_v34 = vld [vmem:[#allocation2 + $0x70] sm:$0xff] }
  0x39   :  { %539 = vmatpush.msra.mxu3 %v522_v34 }
  0x3a   :  { %v188_v36 = vshll.u32 %v187_v35, 30  ;;  %v211_v53 = vsub.s32 4, %v187_v35 }
  0x3c   :  { %v189_v37 = vsub.s32 %v185_v33, %v188_v36  ;;  %v212_v56 = vsel %vm89_vm12, %v211_v53, %v187_v35  ;;  %v416_v33 = vld [vmem:[#allocation2 + $0x40] sm:$0xff]  ;;  %v622_v35 = vld [vmem:[#allocation2 + $0xb0] sm:$0xff]  ;;  %v415_v36 = vld [vmem:[#allocation2 + $0x38] sm:$0xff] }
  0x3d   :  { %v214_v59 = vsel %vm88_vm13, 0, %v212_v56  ;;  %436 = vmatpush.msra.mxu1 %v416_v33  ;;  %639 = vmatpush.msrb.mxu0 %v622_v35 }
  0x3e   :  { %vm190_vm10 = vcmp.lt.s32.totalorder %v189_v37, 0  ;;  %v191_v38 = vsub.s32 0, %v189_v37  ;;  %v231_v0 = vadd.s32 3, %v214_v59  ;;  %v395_v11 = vand.u32 3, %v214_v59 }
  0x3f   :  { %437 = vmatpush.msra.mxu1 %v415_v36  ;;  %v1704_v59 = vmov 16.0  }
  0x40   :  { %v192_v39 = vsel %vm190_vm10, %v191_v38, %v189_v37  ;;  %v232_v7 = vand.u32 3, %v231_v0  ;;  %vm397_vm2 = vcmp.eq.s32.totalorder %v395_v11, 0  ;;  %vm400_vm3 = vcmp.eq.s32.totalorder %v395_v11, 2  ;;  %v621_v38 = vld [vmem:[#allocation2 + $0xa8] sm:$0xff] }
  0x41   :  { %v193_v16 = vclz %v192_v39  ;;  %vm396_vm4 = vcmp.lt.s32.totalorder %v395_v11, 2  ;;  %640 = vmatpush.msrb.mxu0 %v621_v38  ;;  %1597 = vrcp.f32 %v1704_v59  ;;  %v1564_v38 = vld [vmem:[#allocation4 + $0xa] ss:$0 sm:$0xff]  ;;  %v617_v59 = vld [vmem:[#allocation2 + $0x88] sm:$0xff] }
  0x42   :  { %vm237_vm14 = vcmp.eq.s32.totalorder %v232_v7, 2  ;;  %vm234_vm15 = vcmp.eq.s32.totalorder %v232_v7, 0  ;;  %vm233_vm0 = vcmp.lt.s32.totalorder %v232_v7, 2 }
  0x43   :  { %v1507_v40 = vadd.s32 4294967294, %v193_v16  ;;  %v1560_v16 = vld [vmem:[#allocation4] ss:$0 sm:$0xff] }
  0x45   :  { %vm1508_vm11 = vcmp.lt.s32.totalorder %v1507_v40, 0 }
  0x46   :  { %v196_v42 = vsel %vm1508_vm11, 0, %v1507_v40 }
  0x47   :  { %v197_v43 = vsub.s32 32, %v196_v42  ;;  %v198_v44 = vshll.u32 %v189_v37, %v196_v42  ;;  %v201_v45 = vsub.s32 4294967266, %v196_v42  ;;  %v521_v37 = vld [vmem:[#allocation2 + $0x68] sm:$0xff] }
  0x48   :  { %540 = vmatpush.msra.mxu3 %v521_v37 }
  0x49   :  { %v199_v13 = vshrl.u32 %v181_v41, %v197_v43  ;;  %v202_v46 = vadd.s32 127, %v201_v45  ;;  %v1559_v41 = vld [vmem:[#allocation4 + $0x3] ss:$0 sm:$0xff] }
  0x4b   :  { %v200_v47 = vor.u32 %v199_v13, %v198_v44  ;;  %v203_v48 = vshll.u32 %v202_v46, 23  ;;  %v1558_v44 = vld [vmem:[#allocation4 + $0x2] ss:$0 sm:$0xff] }
  0x4d   :  { %v204_v49 = vor.u32 4788187, %v203_v48  ;;  %v207_v50 = vcvt.s32.f32 %v200_v47 }
  0x4f   :  { %v205_v51 = vand.u32 2147483647, %v204_v49 }
  0x51   :  { %v208_v52 = vmul.f32 %v207_v50, %v205_v51 }
  0x53   :  { %v209_v54 = vxor.u32 2147483648, %v208_v52 }
  0x55   :  { %v210_v55 = vsel %vm89_vm12, %v209_v54, %v208_v52  ;;  %v1561_v52 = vld [vmem:[#allocation4 + $0x7] ss:$0 sm:$0xff] }
  0x56   :  { %v213_v57 = vsel %vm88_vm13, %v1736_v1, %v210_v55  ;;  %v1557_v1 = vld [vmem:[#allocation4 + $0x1] ss:$0 sm:$0xff] }
  0x57   :  { %v215_v58 = vmul.f32 %v213_v57, %v213_v57 }
  0x59   :  { %v216_v60 = vmul.f32 -0.001358992, %v215_v58  ;;  %v223_v61 = vmul.f32 -0.00019511016, %v215_v58 }
  0x5b   :  { %v217_v62 = vadd.f32 0.041655596, %v216_v60  ;;  %v224_v63 = vadd.f32 0.008332121, %v223_v61  ;;  %v1598_v60 = vpop.eup %1597 }
  0x5c   :  { %v477_v61 = vmul.f32 16.0, %v1598_v60  ;;  %vm481_vm9 = vweird.f32 %v1598_v60 }
  0x5d   :  { %v218_v2 = vmul.f32 %v217_v62, %v215_v58  ;;  %v225_v3 = vmul.f32 %v224_v63, %v215_v58 }
  0x5e   :  { %v478_v62 = vsub.f32 1.0, %v477_v61 }
  0x5f   :  { %v219_v4 = vadd.f32 -0.4999988, %v218_v2  ;;  %v226_v5 = vadd.f32 -0.16666654, %v225_v3 }
  0x60   :  { %v479_v63 = vmul.f32 %v1598_v60, %v478_v62 }
  0x61   :  { %v220_v8 = vmul.f32 %v219_v4, %v215_v58  ;;  %v227_v9 = vmul.f32 %v226_v5, %v215_v58  ;;  %v520_v4 = vld [vmem:[#allocation2 + $0x60] sm:$0xff]  ;;  %v519_v5 = vld [vmem:[#allocation2 + $0x58] sm:$0xff] }
  0x62   :  { %v480_v0 = vadd.f32 %v1598_v60, %v479_v63  ;;  %562 = vmatpush.msrb.mxu2 %v520_v4 }
  0x63   :  { %v221_v6 = vadd.f32 1.0, %v220_v8  ;;  %v228_v10 = vadd.f32 1.0, %v227_v9 }
  0x64   :  { %v1791_v3 = vsel %vm481_vm9, %v1598_v60, %v480_v0  ;;  %563 = vmatpush.msrb.mxu2 %v519_v5 }
  0x65   :  { %v229_v12 = vmul.f32 %v228_v10, %v213_v57  ;;  %v238_v14 = vxor.u32 2147483648, %v221_v6 }
  0x67   :  { %v235_v15 = vxor.u32 2147483648, %v229_v12  ;;  %v239_v17 = vsel %vm237_vm14, %v238_v14, %v229_v12  ;;  %v402_v22 = vsel %vm400_vm3, %v238_v14, %v229_v12 }
  0x69   :  { %v236_v18 = vsel %vm234_vm15, %v221_v6, %v235_v15  ;;  %v399_v21 = vsel %vm397_vm2, %v221_v6, %v235_v15 }
  0x6a   :  { %v240_v19 = vsel %vm233_vm0, %v236_v18, %v239_v17  ;;  %v403_v23 = vsel %vm396_vm4, %v399_v21, %v402_v22  ;;  %v784_v21 = vld [vmem:[#allocation2 + $0xc8] sm:$0xff] }
  0x6b   :  { %v241_v20 = vsel %vm230_vm1, nan, %v240_v19  ;;  %v404_v24 = vsel %vm230_vm1, nan, %v403_v23  ;;  %v1562_v23 = vld [vmem:[#allocation4 + $0x5] ss:$0 sm:$0xff]  ;;  %vm671_vm1 = vcmask 523264  }
  0x6c   :  { %245 = vperm.xlu1 %1556, %v241_v20   ;;  %v785_v20 = vld [vmem:[#allocation2 + $0xd0] sm:$0xff] }
  0x6d   :  { %800 = vmatpush.msra.mxu2 %v785_v20 }
  0x6f   :  { %801 = vmatpush.msra.mxu2 %v784_v21 }
  0x74   :  { %408 = vperm.xlu1 %1556, %v404_v24  }
  0x7f   :  { %v55_v25 = vpop.permute.xlu0 %54 }
  0x80   :  { %1505 = vmatmul.msk.f32.vlgmr.msra.gmra.mxu0 %vm56_vm5, %v55_v25 }
  0x87   :  { %v82_v40 = vpop.permute.xlu0 %81 }
  0x88   :  { %v85_v42 = vmul.f32 %v1560_v16, %v82_v40 }
  0xb7   :  { %v466_v51 = vpop.f32.mrf.mxu2 }
  0xde   :  { %v246_v39 = vpop.permute.xlu1 %245 }
  0xdf   :  { %v249_v46 = vmul.f32 %v1557_v1, %v246_v39 }
  0xe6   :  { %v409_v13 = vpop.permute.xlu1 %408 }
  0xe7   :  { %v412_v48 = vmul.f32 %v1558_v44, %v409_v13  ;;  %v1705_v44 = vmov 32.0  }
  0xfd   :  { %v76_v43 = vpop.f32.mrf.mxu0 }
  0xfe   :  { %v77_v45 = vadd.f32 %v1559_v41, %v76_v43 }
 0x100   :  { %v86_v47 = vadd.f32 %v85_v42, %v77_v45 }
 0x102   :  { %v250_v49 = vadd.f32 %v249_v46, %v86_v47 }
 0x104   :  { %v413_v50 = vadd.f32 %v412_v48, %v250_v49  ;;  %v721_v49 = vld [vmem:[#allocation2 + $0x100] sm:$0xff] }
 0x105   :  { %736 = vmatpush.msrb.mxu3 %v721_v49 }
 0x106   :  { %1512 = vmatmul.msk.f32.vlgmr.msra.gmra.mxu1 %vm56_vm5, %v413_v50  ;;  %1515 = vmatmul.msk.f32.vlgmr.msra.gmra.mxu3 %vm56_vm5, %v413_v50 }
 0x107   :  { %1517 = vmatmul.msk.f32.vlgmr.msrb.gmra.mxu0 %vm56_vm5, %v413_v50  ;;  %v620_v50 = vld [vmem:[#allocation2 + $0xa0] sm:$0xff] }
 0x108   :  { %660 = vmatpush.msrb.mxu1 %v620_v50 }
 0x183   :  { %v439_v53 = vpop.f32.mrf.mxu1 }
 0x184   :  { %v467_v54 = vadd.f32 %v466_v51, %v439_v53  ;;  %v720_v51 = vld [vmem:[#allocation2 + $0xf8] sm:$0xff] }
 0x185   :  { %v619_v53 = vld [vmem:[#allocation2 + $0x98] sm:$0xff]  ;;  %737 = vmatpush.msrb.mxu3 %v720_v51 }
 0x186   :  { %v471_v55 = vadd.f32 %v1561_v52, %v467_v54  ;;  %v719_v54 = vld [vmem:[#allocation2 + $0xf0] sm:$0xff]  ;;  %661 = vmatpush.msrb.mxu1 %v619_v53 }
 0x187   :  { %738 = vmatpush.msrb.mxu3 %v719_v54 }
 0x188   :  { %v473_v56 = vsel %vm472_vm8, %v471_v55, 0.0  ;;  %v484_v57 = vmul.f32 %v471_v55, %v471_v55 }
 0x189   :  { %474 = vadd.xlane.f32.xlu2 %v473_v56  ;;  %v542_v39 = vpop.f32.mrf.mxu3 }
 0x18a   :  { %v485_v58 = vsel %vm472_vm8, %v484_v57, 0.0 }
 0x191   :  { %486 = vadd.xlane.f32.xlu2 %v485_v58  ;;  %v718_v58 = vld [vmem:[#allocation2 + $0xe8] sm:$0xff] }
 0x192   :  { %739 = vmatpush.msrb.mxu3 %v718_v58  ;;  %v808_v58 = vld [vmem:[#allocation2 + $0xd8] sm:$0xff] }
 0x1fc   :  { %v475_v2 = vpop.xlane.xlu2 %474 }
 0x1fd   :  { %v483_v7 = vmul.f32 %v1791_v3, %v475_v2 }
 0x1ff   :  { %v489_v9 = vmul.f32 %v483_v7, %v483_v7  ;;  %v491_v22 = vsub.f32 %v471_v55, %v483_v7  ;;  %v618_v55 = vld [vmem:[#allocation2 + $0x90] sm:$0xff] }
 0x200   :  { %662 = vmatpush.msrb.mxu1 %v618_v55 }
 0x202   :  { %663 = vmatpush.msrb.mxu1 %v617_v59 }
 0x204   :  { %v487_v8 = vpop.xlane.xlu2 %486 }
 0x205   :  { %v488_v6 = vmul.f32 %v487_v8, %v1791_v3 }
 0x207   :  { %v490_v10 = vsub.f32 %v488_v6, %v489_v9 }
 0x209   :  { %v492_v11 = vadd.f32 1e-05, %v490_v10  ;;  %v1566_v10 = vld [vmem:[#allocation4 + $0x8] ss:$0 sm:$0xff] }
 0x20b   :  { %1599 = vrsqrt.f32 %v492_v11  ;;  %vm499_vm11 = vweird.f32 %v492_v11 }
 0x211   :  { %v1600_v12 = vpop.eup %1599 }
 0x212   :  { %v494_v14 = vmul.f32 %v1600_v12, %v492_v11  ;;  %vm500_vm10 = vweird.f32 %v1600_v12 }
 0x213   :  { %vm501_vm12 = vmor %vm499_vm11, %vm500_vm10 }
 0x214   :  { %v495_v15 = vmul.f32 %v1600_v12, %v494_v14  ;;  %v1567_v14 = vld [vmem:[#allocation4 + $0x9] ss:$0 sm:$0xff] }
 0x216   :  { %v496_v17 = vmul.f32 0.5, %v495_v15 }
 0x218   :  { %v497_v18 = vsub.f32 1.5, %v496_v17 }
 0x21a   :  { %v498_v19 = vmul.f32 %v1600_v12, %v497_v18 }
 0x21c   :  { %v502_v24 = vsel %vm501_vm12, %v1600_v12, %v498_v19 }
 0x21d   :  { %v503_v25 = vmul.f32 %v502_v24, %v491_v22 }
 0x21f   :  { %v506_v27 = vmul.f32 %v1562_v23, %v503_v25 }
 0x221   :  { %v509_v28 = vadd.f32 %v1563_v26, %v506_v27  ;;  %v1569_v27 = vld [vmem:[#allocation4 + $0x12] ss:$0 sm:$0xff] }
 0x223   :  { %v510_v29 = vmul.f32 %v509_v28, %v509_v28 }
 0x225   :  { %v511_v30 = vmul.f32 %v510_v29, %v509_v28 }
 0x227   :  { %v512_v31 = vmul.f32 0.044715, %v511_v30 }
 0x229   :  { %v513_v32 = vadd.f32 %v512_v31, %v509_v28 }
 0x22b   :  { %v514_v33 = vmul.f32 0.7978846, %v513_v32 }
 0x22d   :  { %1601 = vtanh.f32 %v514_v33  ;;  %v642_v33 = vpop.f32.mrf.mxu0 }
 0x22e   :  { %1603 = vrcp.f32 %v1705_v44 }
 0x233   :  { %v1602_v34 = vpop.eup %1601 }
 0x234   :  { %v516_v35 = vadd.f32 1.0, %v1602_v34  ;;  %v1604_v45 = vpop.eup %1603 }
 0x235   :  { %v575_v13 = vmul.f32 32.0, %v1604_v45  ;;  %vm579_vm13 = vweird.f32 %v1604_v45 }
 0x236   :  { %v517_v36 = vmul.f32 0.5, %v516_v35  ;;  %v1568_v35 = vld [vmem:[#allocation4 + $0xd] ss:$0 sm:$0xff] }
 0x237   :  { %v576_v46 = vsub.f32 1.0, %v575_v13 }
 0x238   :  { %v1795_v37 = vmul.f32 %v517_v36, %v509_v28 }
 0x239   :  { %v577_v47 = vmul.f32 %v1604_v45, %v576_v46 }
 0x23a   :  { %1516 = vmatmul.msk.f32.vlgmr.msrb.gmra.mxu2 %vm472_vm8, %v1795_v37 }
 0x23b   :  { %v578_v48 = vadd.f32 %v1604_v45, %v577_v47 }
 0x23d   :  { %v1803_v52 = vsel %vm579_vm13, %v1604_v45, %v578_v48 }
 0x242   :  { %1520 = vmatmul.msk.f32.vlgmr.msra.gmra.mxu2 %vm472_vm8, %v1795_v37 }
 0x2bd   :  { %v565_v16 = vpop.f32.mrf.mxu2 }
 0x2be   :  { %v566_v40 = vadd.f32 %v565_v16, %v542_v39 }
 0x2c0   :  { %v570_v41 = vadd.f32 %v1564_v38, %v566_v40 }
 0x2c2   :  { %v571_v1 = vsel %vm56_vm5, %v570_v41, 0.0  ;;  %v582_v42 = vmul.f32 %v570_v41, %v570_v41 }
 0x2c3   :  { %572 = vadd.xlane.f32.xlu1 %v571_v1 }
 0x2c4   :  { %v583_v43 = vsel %vm56_vm5, %v582_v42, 0.0 }
 0x2c5   :  { %584 = vadd.xlane.f32.xlu2 %v583_v43 }
 0x336   :  { %v573_v56 = vpop.xlane.xlu1 %572 }
 0x337   :  { %v581_v57 = vmul.f32 %v1803_v52, %v573_v56 }
 0x338   :  { %v585_v60 = vpop.xlane.xlu2 %584 }
 0x339   :  { %v587_v61 = vmul.f32 %v581_v57, %v581_v57  ;;  %v586_v62 = vmul.f32 %v585_v60, %v1803_v52  ;;  %v589_v6 = vsub.f32 %v570_v41, %v581_v57  ;;  %v1706_v41 = vmov 64.0   ;;  %v809_v57 = vld [vmem:[#allocation2 + $0xe0] sm:$0xff] }
 0x33a   :  { %827 = vmatpush.msra.mxu0 %v809_v57  ;;  %v1565_v57 = vld [vmem:[#allocation4 + $0x13] ss:$0 sm:$0xff] }
 0x33b   :  { %v588_v63 = vsub.f32 %v586_v62, %v587_v61 }
 0x33c   :  { %828 = vmatpush.msra.mxu0 %v808_v58  ;;  %v803_v58 = vpop.f32.mrf.mxu2 }
 0x33d   :  { %v590_v0 = vadd.f32 1e-05, %v588_v63 }
 0x33f   :  { %1605 = vrsqrt.f32 %v590_v0  ;;  %vm597_vm15 = vweird.f32 %v590_v0 }
 0x345   :  { %v1606_v2 = vpop.eup %1605 }
 0x346   :  { %v592_v4 = vmul.f32 %v1606_v2, %v590_v0  ;;  %vm598_vm14 = vweird.f32 %v1606_v2 }
 0x347   :  { %vm599_vm0 = vmor %vm597_vm15, %vm598_vm14 }
 0x348   :  { %v593_v5 = vmul.f32 %v1606_v2, %v592_v4 }
 0x34a   :  { %v594_v7 = vmul.f32 0.5, %v593_v5 }
 0x34c   :  { %v595_v8 = vsub.f32 1.5, %v594_v7 }
 0x34e   :  { %v596_v9 = vmul.f32 %v1606_v2, %v595_v8  ;;  %v962_v8 = vld [vmem:[#allocation2 + $0x1a0] sm:$0xff] }
 0x34f   :  { %976 = vmatpush.msrb.mxu0 %v962_v8 }
 0x350   :  { %v600_v11 = vsel %vm599_vm0, %v1606_v2, %v596_v9  ;;  %v961_v9 = vld [vmem:[#allocation2 + $0x198] sm:$0xff] }
 0x351   :  { %v601_v12 = vmul.f32 %v600_v11, %v589_v6  ;;  %977 = vmatpush.msrb.mxu0 %v961_v9 }
 0x353   :  { %v604_v15 = vmul.f32 %v1566_v10, %v601_v12  ;;  %v1570_v10 = vld [vmem:[#allocation4 + $0xe] ss:$0 sm:$0xff] }
 0x354   :  { %v960_v12 = vld [vmem:[#allocation2 + $0x190] sm:$0xff] }
 0x355   :  { %v607_v17 = vadd.f32 %v1567_v14, %v604_v15  ;;  %v1571_v14 = vld [vmem:[#allocation4 + $0xf] ss:$0 sm:$0xff]  ;;  %978 = vmatpush.msrb.mxu0 %v960_v12 }
 0x357   :  { %v608_v18 = vmul.f32 %v607_v17, %v607_v17 }
 0x359   :  { %v609_v19 = vmul.f32 %v608_v18, %v607_v17 }
 0x35b   :  { %v610_v20 = vmul.f32 0.044715, %v609_v19  ;;  %v958_v19 = vld [vmem:[#allocation2 + $0x180] sm:$0xff] }
 0x35d   :  { %v611_v21 = vadd.f32 %v610_v20, %v607_v17 }
 0x35f   :  { %v612_v22 = vmul.f32 0.7978846, %v611_v21 }
 0x361   :  { %1607 = vtanh.f32 %v612_v22 }
 0x362   :  { %1609 = vrcp.f32 %v1706_v41 }
 0x367   :  { %v1608_v23 = vpop.eup %1607 }
 0x368   :  { %v614_v24 = vadd.f32 1.0, %v1608_v23  ;;  %v1610_v1 = vpop.eup %1609  ;;  %v957_v23 = vld [vmem:[#allocation2 + $0x178] sm:$0xff] }
 0x369   :  { %v676_v42 = vmul.f32 64.0, %v1610_v1  ;;  %vm680_vm2 = vweird.f32 %v1610_v1 }
 0x36a   :  { %v615_v25 = vmul.f32 0.5, %v614_v24 }
 0x36b   :  { %v677_v44 = vsub.f32 1.0, %v676_v42 }
 0x36c   :  { %v1807_v26 = vmul.f32 %v615_v25, %v607_v17  ;;  %v959_v17 = vld [vmem:[#allocation2 + $0x188] sm:$0xff] }
 0x36d   :  { %v678_v48 = vmul.f32 %v1610_v1, %v677_v44  ;;  %979 = vmatpush.msrb.mxu0 %v959_v17  ;;  %v874_v17 = vld [vmem:[#allocation2 + $0x110] sm:$0xff] }
 0x36e   :  { %1518 = vmatmul.msk.f32.vlgmr.msrb.gmra.mxu1 %vm56_vm5, %v1807_v26  ;;  %1519 = vmatmul.msk.f32.vlgmr.msrb.gmra.mxu3 %vm56_vm5, %v1807_v26 }
 0x36f   :  { %v679_v51 = vadd.f32 %v1610_v1, %v678_v48  ;;  %980 = vmatpush.msrb.mxu0 %v958_v19  ;;  %894 = vmatpush.msra.mxu1 %v874_v17 }
 0x371   :  { %v681_v54 = vsel %vm680_vm2, %v1610_v1, %v679_v51  ;;  %981 = vmatpush.msrb.mxu0 %v957_v23 }
 0x3eb   :  { %v665_v30 = vpop.f32.mrf.mxu1 }
 0x3ec   :  { %v666_v34 = vadd.f32 %v665_v30, %v642_v33  ;;  %v955_v30 = vld [vmem:[#allocation2 + $0x168] sm:$0xff] }
 0x3ee   :  { %v1820_v38 = vadd.f32 %v1568_v35, %v666_v34 }
 0x3f0   :  { %v672_v39 = vsel %vm671_vm1, %v1820_v38, 0.0  ;;  %v683_v16 = vmul.f32 %v1820_v38, %v1820_v38 }
 0x3f1   :  { %v741_v28 = vpop.f32.mrf.mxu3 }
 0x3f2   :  { %v1813_v29 = vadd.f32 %v1569_v27, %v741_v28  ;;  %v684_v40 = vsel %vm671_vm1, %v683_v16, 0.0  ;;  %v956_v27 = vld [vmem:[#allocation2 + $0x170] sm:$0xff] }
 0x3f3   :  { %982 = vmatpush.msrb.mxu0 %v956_v27  ;;  %v1030_v27 = vld [vmem:[#allocation2 + $0x138] sm:$0xff] }
 0x3f4   :  { %v744_v31 = vsel %vm472_vm8, %v1813_v29, 0.0  ;;  %v748_v32 = vmul.f32 %v1813_v29, %v1813_v29 }
 0x3f5   :  { %745 = vadd.xlane.f32.xlu0 %v744_v31  ;;  %983 = vmatpush.msrb.mxu0 %v955_v30 }
 0x3f6   :  { %v749_v36 = vsel %vm472_vm8, %v748_v32, 0.0 }
 0x3f7   :  { %750 = vadd.xlane.f32.xlu2 %v749_v36  ;;  %v1572_v36 = vld [vmem:[#allocation4 + $0xb] ss:$0 sm:$0xff] }
 0x3ff   :  { %673 = vadd.xlane.f32.xlu2 %v672_v39 }
 0x407   :  { %685 = vadd.xlane.f32.xlu2 %v684_v40  ;;  %v1573_v40 = vld [vmem:[#allocation4 + $0xc] ss:$0 sm:$0xff] }
 0x468   :  { %v746_v43 = vpop.xlane.xlu0 %745 }
 0x469   :  { %v747_v45 = vmul.f32 %v746_v43, %v1791_v3 }
 0x46a   :  { %v751_v13 = vpop.xlane.xlu2 %750 }
 0x46b   :  { %v753_v46 = vmul.f32 %v747_v45, %v747_v45  ;;  %v752_v47 = vmul.f32 %v751_v13, %v1791_v3  ;;  %v755_v6 = vsub.f32 %v1813_v29, %v747_v45 }
 0x46d   :  { %v754_v49 = vsub.f32 %v752_v47, %v753_v46 }
 0x46f   :  { %v756_v50 = vadd.f32 1e-05, %v754_v49  ;;  %v1279_v49 = vld [vmem:[#allocation2 + $0x1f0] sm:$0xff] }
 0x471   :  { %1611 = vrsqrt.f32 %v756_v50  ;;  %vm763_vm4 = vweird.f32 %v756_v50 }
 0x472   :  { %v674_v53 = vpop.xlane.xlu2 %673 }
 0x473   :  { %v682_v56 = vmul.f32 %v681_v54, %v674_v53 }
 0x475   :  { %v688_v62 = vmul.f32 %v682_v56, %v682_v56  ;;  %v690_v35 = vsub.f32 %v1820_v38, %v682_v56  ;;  %v1278_v38 = vld [vmem:[#allocation2 + $0x1e8] sm:$0xff] }
 0x477   :  { %v1612_v55 = vpop.eup %1611 }
 0x478   :  { %v758_v59 = vmul.f32 %v1612_v55, %v756_v50  ;;  %vm764_vm3 = vweird.f32 %v1612_v55 }
 0x479   :  { %vm765_vm6 = vmor %vm763_vm4, %vm764_vm3 }
 0x47a   :  { %v759_v60 = vmul.f32 %v1612_v55, %v758_v59  ;;  %v686_v61 = vpop.xlane.xlu2 %685  ;;  %v807_v59 = vadd.f32 %v1565_v57, %v803_v58 }
 0x47b   :  { %v687_v63 = vmul.f32 %v686_v61, %v681_v54 }
 0x47c   :  { %v760_v0 = vmul.f32 0.5, %v759_v60 }
 0x47d   :  { %v689_v2 = vsub.f32 %v687_v63, %v688_v62 }
 0x47e   :  { %v761_v4 = vsub.f32 1.5, %v760_v0 }
 0x47f   :  { %v691_v5 = vadd.f32 1e-05, %v689_v2  ;;  %v1574_v2 = vld [vmem:[#allocation4 + $0x1a] ss:$0 sm:$0xff] }
 0x480   :  { %v762_v7 = vmul.f32 %v1612_v55, %v761_v4 }
 0x481   :  { %1613 = vrsqrt.f32 %v691_v5  ;;  %vm698_vm9 = vweird.f32 %v691_v5 }
 0x482   :  { %v766_v11 = vsel %vm765_vm6, %v1612_v55, %v762_v7 }
 0x483   :  { %v767_v15 = vmul.f32 %v766_v11, %v755_v6 }
 0x485   :  { %v770_v18 = vmul.f32 %v1570_v10, %v767_v15 }
 0x487   :  { %v1614_v20 = vpop.eup %1613  ;;  %v773_v21 = vadd.f32 %v1571_v14, %v770_v18  ;;  %v873_v18 = vld [vmem:[#allocation2 + $0x108] sm:$0xff] }
 0x488   :  { %v693_v22 = vmul.f32 %v1614_v20, %v691_v5  ;;  %vm699_vm7 = vweird.f32 %v1614_v20  ;;  %895 = vmatpush.msra.mxu1 %v873_v18 }
 0x489   :  { %v774_v24 = vmul.f32 %v773_v21, %v773_v21  ;;  %vm700_vm10 = vmor %vm698_vm9, %vm699_vm7 }
 0x48a   :  { %v694_v25 = vmul.f32 %v1614_v20, %v693_v22 }
 0x48b   :  { %v775_v28 = vmul.f32 %v774_v24, %v773_v21 }
 0x48c   :  { %v695_v29 = vmul.f32 0.5, %v694_v25  ;;  %v1031_v25 = vld [vmem:[#allocation2 + $0x140] sm:$0xff] }
 0x48d   :  { %v776_v31 = vmul.f32 0.044715, %v775_v28  ;;  %1044 = vmatpush.msrb.mxu1 %v1031_v25 }
 0x48e   :  { %v696_v32 = vsub.f32 1.5, %v695_v29  ;;  %v1576_v29 = vld [vmem:[#allocation4 + $0x10] ss:$0 sm:$0xff] }
 0x48f   :  { %v777_v33 = vadd.f32 %v776_v31, %v773_v21  ;;  %v1029_v31 = vld [vmem:[#allocation2 + $0x130] sm:$0xff]  ;;  %1045 = vmatpush.msrb.mxu1 %v1030_v27 }
 0x490   :  { %v697_v34 = vmul.f32 %v1614_v20, %v696_v32  ;;  %v1577_v32 = vld [vmem:[#allocation4 + $0x11] ss:$0 sm:$0xff] }
 0x491   :  { %v778_v39 = vmul.f32 0.7978846, %v777_v33  ;;  %1046 = vmatpush.msrb.mxu1 %v1029_v31 }
 0x492   :  { %v701_v16 = vsel %vm700_vm10, %v1614_v20, %v697_v34  ;;  %v1028_v34 = vld [vmem:[#allocation2 + $0x128] sm:$0xff] }
 0x493   :  { %v702_v41 = vmul.f32 %v701_v16, %v690_v35  ;;  %1615 = vtanh.f32 %v778_v39  ;;  %1047 = vmatpush.msrb.mxu1 %v1028_v34  ;;  %v901_v39 = vld [vmem:[#allocation2 + $0x120] sm:$0xff]  ;;  %v900_v16 = vld [vmem:[#allocation2 + $0x118] sm:$0xff] }
 0x494   :  { %921 = vmatpush.msra.mxu3 %v901_v39  ;;  %v1124_v39 = vld [vmem:[#allocation2 + $0x1c0] sm:$0xff] }
 0x495   :  { %v705_v1 = vmul.f32 %v1572_v36, %v702_v41 }
 0x496   :  { %922 = vmatpush.msra.mxu3 %v900_v16  ;;  %v1123_v16 = vld [vmem:[#allocation2 + $0x1b8] sm:$0xff] }
 0x497   :  { %v708_v42 = vadd.f32 %v1573_v40, %v705_v1 }
 0x499   :  { %v1616_v43 = vpop.eup %1615  ;;  %v709_v44 = vmul.f32 %v708_v42, %v708_v42 }
 0x49a   :  { %v780_v45 = vadd.f32 1.0, %v1616_v43 }
 0x49b   :  { %v710_v13 = vmul.f32 %v709_v44, %v708_v42 }
 0x49c   :  { %v781_v46 = vmul.f32 0.5, %v780_v45 }
 0x49d   :  { %v711_v47 = vmul.f32 0.044715, %v710_v13 }
 0x49e   :  { %v1831_v48 = vmul.f32 %v781_v46, %v773_v21 }
 0x49f   :  { %v712_v50 = vadd.f32 %v711_v47, %v708_v42 }
 0x4a0   :  { %1521 = vmatmul.msk.f32.vlgmr.msra.gmra.mxu0 %vm472_vm8, %v1831_v48 }
 0x4a1   :  { %v713_v51 = vmul.f32 0.7978846, %v712_v50  ;;  %1294 = vmatpush.msra.mxu0 %v1279_v49 }
 0x4a3   :  { %1617 = vtanh.f32 %v713_v51  ;;  %1295 = vmatpush.msra.mxu0 %v1278_v38 }
 0x4a9   :  { %v1618_v53 = vpop.eup %1617 }
 0x4aa   :  { %v715_v54 = vadd.f32 1.0, %v1618_v53 }
 0x4ac   :  { %v716_v55 = vmul.f32 0.5, %v715_v54 }
 0x4ae   :  { %v717_v56 = vmul.f32 %v716_v55, %v708_v42 }
 0x4b0   :  { %1525 = vmatmul.msk.f32.vlgmr.msrb.gmra.mxu0 %vm671_vm1, %v717_v56 }
 0x4b8   :  { %1532 = vmatmul.msk.f32.vlgmr.msra.gmra.mxu0 %vm472_vm8, %v1795_v37 }
 0x51d   :  { %v830_v60 = vpop.f32.mrf.mxu0 }
 0x51e   :  { %v833_v61 = vadd.f32 %v830_v60, %v807_v59 }
 0x520   :  { %v834_v62 = vsel %vm472_vm8, %v833_v61, 0.0  ;;  %v838_v63 = vmul.f32 %v833_v61, %v833_v61 }
 0x521   :  { %835 = vadd.xlane.f32.xlu2 %v834_v62  ;;  %v1578_v62 = vld [vmem:[#allocation4 + $0x16] ss:$0 sm:$0xff] }
 0x522   :  { %v839_v0 = vsel %vm472_vm8, %v838_v63, 0.0 }
 0x529   :  { %840 = vadd.xlane.f32.xlu2 %v839_v0  ;;  %v1579_v0 = vld [vmem:[#allocation4 + $0x17] ss:$0 sm:$0xff] }
 0x52d   :  { %v985_v4 = vpop.f32.mrf.mxu0 }
 0x52e   :  { %v1840_v5 = vadd.f32 %v1574_v2, %v985_v4 }
 0x530   :  { %v988_v7 = vsel %vm56_vm5, %v1840_v5, 0.0  ;;  %v992_v37 = vmul.f32 %v1840_v5, %v1840_v5 }
 0x531   :  { %989 = vadd.xlane.f32.xlu1 %v988_v7  ;;  %v1057_v7 = vld [vmem:[#allocation2 + $0x160] sm:$0xff] }
 0x532   :  { %v993_v8 = vsel %vm56_vm5, %v992_v37, 0.0  ;;  %v1056_v37 = vld [vmem:[#allocation2 + $0x158] sm:$0xff]  ;;  %1073 = vmatpush.msrb.mxu3 %v1057_v7 }
 0x533   :  { %994 = vadd.xlane.f32.xlu2 %v993_v8 }
 0x534   :  { %1074 = vmatpush.msrb.mxu3 %v1056_v37 }
 0x594   :  { %v836_v9 = vpop.xlane.xlu2 %835 }
 0x595   :  { %v837_v6 = vmul.f32 %v836_v9, %v1791_v3  ;;  %v1055_v9 = vld [vmem:[#allocation2 + $0x150] sm:$0xff] }
 0x596   :  { %1075 = vmatpush.msrb.mxu3 %v1055_v9  ;;  %v1150_v9 = vld [vmem:[#allocation2 + $0x1c8] sm:$0xff] }
 0x597   :  { %v843_v11 = vmul.f32 %v837_v6, %v837_v6  ;;  %v845_v28 = vsub.f32 %v833_v61, %v837_v6 }
 0x59c   :  { %v841_v10 = vpop.xlane.xlu2 %840 }
 0x59d   :  { %v842_v12 = vmul.f32 %v841_v10, %v1791_v3  ;;  %v1054_v10 = vld [vmem:[#allocation2 + $0x148] sm:$0xff] }
 0x59e   :  { %1076 = vmatpush.msrb.mxu3 %v1054_v10  ;;  %v1302_v10 = vld [vmem:[#allocation2 + $0x1f8] sm:$0xff] }
 0x59f   :  { %v844_v14 = vsub.f32 %v842_v12, %v843_v11 }
 0x5a1   :  { %v846_v15 = vadd.f32 1e-05, %v844_v14 }
 0x5a3   :  { %1619 = vrsqrt.f32 %v846_v15  ;;  %vm853_vm12 = vweird.f32 %v846_v15 }
 0x5a4   :  { %v990_v47 = vpop.xlane.xlu1 %989 }
 0x5a5   :  { %v991_v49 = vmul.f32 %v990_v47, %v1803_v52 }
 0x5a6   :  { %v995_v50 = vpop.xlane.xlu2 %994 }
 0x5a7   :  { %v997_v38 = vmul.f32 %v991_v49, %v991_v49  ;;  %v996_v51 = vmul.f32 %v995_v50, %v1803_v52  ;;  %v999_v61 = vsub.f32 %v1840_v5, %v991_v49  ;;  %v1580_v5 = vld [vmem:[#allocation4 + $0x14] ss:$0 sm:$0xff] }
 0x5a9   :  { %v1620_v19 = vpop.eup %1619  ;;  %v998_v53 = vsub.f32 %v996_v51, %v997_v38 }
 0x5aa   :  { %v848_v20 = vmul.f32 %v1620_v19, %v846_v15  ;;  %vm854_vm11 = vweird.f32 %v1620_v19 }
 0x5ab   :  { %vm855_vm13 = vmor %vm853_vm12, %vm854_vm11  ;;  %v1000_v54 = vadd.f32 1e-05, %v998_v53  ;;  %v1153_v53 = vld [vmem:[#allocation2 + $0x1e0] sm:$0xff] }
 0x5ac   :  { %v849_v21 = vmul.f32 %v1620_v19, %v848_v20 }
 0x5ad   :  { %vm1007_vm15 = vweird.f32 %v1000_v54 }
 0x5ae   :  { %v850_v22 = vmul.f32 0.5, %v849_v21 }
 0x5b0   :  { %v851_v23 = vsub.f32 1.5, %v850_v22  ;;  %v1860_v22 = vld [vmem:[#allocation2 + $0x260] sm:$0xff] }
 0x5b1   :  { %949 = vmatpush.msrb.mxu2 %v1860_v22 }
 0x5b2   :  { %v852_v24 = vmul.f32 %v1620_v19, %v851_v23  ;;  %v1863_v23 = vld [vmem:[#allocation2 + $0x258] sm:$0xff] }
 0x5b3   :  { %950 = vmatpush.msrb.mxu2 %v1863_v23 }
 0x5b4   :  { %v856_v30 = vsel %vm855_vm13, %v1620_v19, %v852_v24  ;;  %v1582_v24 = vld [vmem:[#allocation4 + $0x15] ss:$0 sm:$0xff] }
 0x5b5   :  { %v857_v33 = vmul.f32 %v856_v30, %v845_v28  ;;  %v1581_v28 = vld [vmem:[#allocation4 + $0x1b] ss:$0 sm:$0xff]  ;;  %1142 = vmatpush.msra.mxu2 %v1124_v39 }
 0x5b7   :  { %v860_v35 = vmul.f32 %v1576_v29, %v857_v33  ;;  %1143 = vmatpush.msra.mxu2 %v1123_v16 }
 0x5b9   :  { %v863_v36 = vadd.f32 %v1577_v32, %v860_v35 }
 0x5bb   :  { %v864_v40 = vmul.f32 %v863_v36, %v863_v36 }
 0x5bd   :  { %v865_v41 = vmul.f32 %v864_v40, %v863_v36 }
 0x5bf   :  { %v866_v1 = vmul.f32 0.044715, %v865_v41 }
 0x5c1   :  { %v867_v42 = vadd.f32 %v866_v1, %v863_v36 }
 0x5c3   :  { %v868_v43 = vmul.f32 0.7978846, %v867_v42 }
 0x5c5   :  { %1621 = vtanh.f32 %v868_v43 }
 0x5c6   :  { %1623 = vrsqrt.f32 %v1000_v54 }
 0x5cb   :  { %v1622_v44 = vpop.eup %1621 }
 0x5cc   :  { %v870_v45 = vadd.f32 1.0, %v1622_v44  ;;  %v1624_v55 = vpop.eup %1623  ;;  %v1121_v44 = vld [vmem:[#allocation2 + $0x1a8] sm:$0xff] }
 0x5cd   :  { %v1002_v56 = vmul.f32 %v1624_v55, %v1000_v54  ;;  %vm1008_vm14 = vweird.f32 %v1624_v55  ;;  %v1152_v54 = vld [vmem:[#allocation2 + $0x1d8] sm:$0xff] }
 0x5ce   :  { %v871_v13 = vmul.f32 0.5, %v870_v45  ;;  %vm1009_vm0 = vmor %vm1007_vm15, %vm1008_vm14 }
 0x5cf   :  { %v1003_v57 = vmul.f32 %v1624_v55, %v1002_v56  ;;  %v1583_v56 = vld [vmem:[#allocation4 + $0x18] ss:$0 sm:$0xff] }
 0x5d0   :  { %v872_v46 = vmul.f32 %v871_v13, %v863_v36 }
 0x5d1   :  { %v1004_v58 = vmul.f32 0.5, %v1003_v57  ;;  %v1151_v57 = vld [vmem:[#allocation2 + $0x1d0] sm:$0xff] }
 0x5d2   :  { %1522 = vmatmul.msk.f32.vlgmr.msra.gmra.mxu1 %vm472_vm8, %v872_v46 }
 0x5d3   :  { %v1005_v59 = vsub.f32 1.5, %v1004_v58  ;;  %1171 = vmatpush.msra.mxu1 %v1153_v53  ;;  %v1584_v58 = vld [vmem:[#allocation4 + $0x19] ss:$0 sm:$0xff] }
 0x5d5   :  { %v1006_v60 = vmul.f32 %v1624_v55, %v1005_v59  ;;  %1172 = vmatpush.msra.mxu1 %v1152_v54 }
 0x5d7   :  { %1173 = vmatpush.msra.mxu1 %v1151_v57 }
 0x5d9   :  { %1174 = vmatpush.msra.mxu1 %v1150_v9 }
 0x5da   :  { %1526 = vmatmul.msk.f32.vlgmr.msrb.gmra.mxu1 %vm56_vm5, %v1807_v26  ;;  %v1010_v26 = vsel %vm1009_vm0, %v1624_v55, %v1006_v60 }
 0x5db   :  { %v1011_v63 = vmul.f32 %v1010_v26, %v999_v61 }
 0x5dd   :  { %v1014_v2 = vmul.f32 %v1578_v62, %v1011_v63 }
 0x5df   :  { %v1017_v4 = vadd.f32 %v1579_v0, %v1014_v2 }
 0x5e1   :  { %v1018_v8 = vmul.f32 %v1017_v4, %v1017_v4 }
 0x5e3   :  { %v1019_v6 = vmul.f32 %v1018_v8, %v1017_v4 }
 0x5e5   :  { %v1020_v11 = vmul.f32 0.044715, %v1019_v6  ;;  %v1303_v6 = vld [vmem:[#allocation2 + $0x200] sm:$0xff] }
 0x5e6   :  { %1321 = vmatpush.msrb.mxu1 %v1303_v6 }
 0x5e7   :  { %v1021_v12 = vadd.f32 %v1020_v11, %v1017_v4  ;;  %v1183_v11 = vld [vmem:[#allocation2 + $0x280] sm:$0xff] }
 0x5e8   :  { %1322 = vmatpush.msrb.mxu1 %v1302_v10 }
 0x5e9   :  { %v1022_v14 = vmul.f32 0.7978846, %v1021_v12  ;;  %v1182_v12 = vld [vmem:[#allocation2 + $0x278] sm:$0xff] }
 0x5eb   :  { %1625 = vtanh.f32 %v1022_v14 }
 0x5f1   :  { %v1626_v15 = vpop.eup %1625 }
 0x5f2   :  { %v1024_v19 = vadd.f32 1.0, %v1626_v15 }
 0x5f4   :  { %v1025_v20 = vmul.f32 0.5, %v1024_v19 }
 0x5f6   :  { %v1856_v21 = vmul.f32 %v1025_v20, %v1017_v4  ;;  %v1181_v20 = vld [vmem:[#allocation2 + $0x270] sm:$0xff] }
 0x64f   :  { %v897_v17 = vpop.f32.mrf.mxu1 }
 0x650   :  { %v898_v18 = vadd.f32 %v1580_v5, %v897_v17  ;;  %v1586_v5 = vld [vmem:[#allocation4 + $0x1c] ss:$0 sm:$0xff] }
 0x652   :  { %1523 = vmatmul.msk.f32.vlgmr.msra.gmra.mxu3 %vm472_vm8, %v898_v18  ;;  %v1875_v18 = vld [vmem:[#allocation4 + $0x26] ss:$0 sm:$0xff] }
 0x653   :  { %1201 = vmatpush.msra.mxu3 %v1183_v11 }
 0x655   :  { %1202 = vmatpush.msra.mxu3 %v1182_v12 }
 0x657   :  { %v1049_v30 = vpop.f32.mrf.mxu1  ;;  %1203 = vmatpush.msra.mxu3 %v1181_v20 }
 0x658   :  { %v1053_v31 = vadd.f32 %v1581_v28, %v1049_v30  ;;  %v1210_v28 = vld [vmem:[#allocation2 + $0x220] sm:$0xff] }
 0x65a   :  { %1527 = vmatmul.msk.f32.vlgmr.msrb.gmra.mxu3 %vm56_vm5, %v1856_v21 }
 0x6d5   :  { %v924_v25 = vpop.f32.mrf.mxu3 }
 0x6d6   :  { %v925_v27 = vadd.f32 %v1582_v24, %v924_v25  ;;  %v1180_v24 = vld [vmem:[#allocation2 + $0x268] sm:$0xff]  ;;  %v1212_v25 = vld [vmem:[#allocation2 + $0x230] sm:$0xff] }
 0x6d7   :  { %1204 = vmatpush.msra.mxu3 %v1180_v24 }
 0x6d8   :  { %v927_v29 = vadd.f32 %v925_v27, %v1831_v48  ;;  %v1122_v48 = vld [vmem:[#allocation2 + $0x1b0] sm:$0xff]  ;;  %v1211_v27 = vld [vmem:[#allocation2 + $0x228] sm:$0xff] }
 0x6d9   :  { %1144 = vmatpush.msra.mxu2 %v1122_v48  ;;  %v1328_v48 = vld [vmem:[#allocation2 + $0x208] sm:$0xff] }
 0x6da   :  { %1524 = vmatmul.msk.f32.vlgmr.msrb.gmra.mxu2 %vm472_vm8, %v927_v29  ;;  %v1587_v29 = vld [vmem:[#allocation4 + $0x1d] ss:$0 sm:$0xff] }
 0x6db   :  { %1145 = vmatpush.msra.mxu2 %v1121_v44 }
 0x6dd   :  { %v1078_v32 = vpop.f32.mrf.mxu3  ;;  %1230 = vmatpush.msrb.mxu2 %v1212_v25 }
 0x6de   :  { %v1081_v33 = vadd.f32 %v1078_v32, %v1053_v31  ;;  %v1588_v32 = vld [vmem:[#allocation4 + $0x27] ss:$0 sm:$0xff] }
 0x6df   :  { %1231 = vmatpush.msrb.mxu2 %v1211_v27 }
 0x6e0   :  { %v1082_v34 = vsel %vm56_vm5, %v1081_v33, 0.0  ;;  %v1086_v35 = vmul.f32 %v1081_v33, %v1081_v33 }
 0x6e1   :  { %1083 = vadd.xlane.f32.xlu0 %v1082_v34  ;;  %1232 = vmatpush.msrb.mxu2 %v1210_v28 }
 0x6e2   :  { %v1087_v36 = vsel %vm56_vm5, %v1086_v35, 0.0  ;;  %v1589_v35 = vld [vmem:[#allocation4 + $0x22] ss:$0 sm:$0xff] }
 0x6e3   :  { %1088 = vadd.xlane.f32.xlu1 %v1087_v36 }
 0x754   :  { %v1084_v40 = vpop.xlane.xlu0 %1083 }
 0x755   :  { %v1085_v41 = vmul.f32 %v1084_v40, %v1803_v52 }
 0x756   :  { %v1089_v1 = vpop.xlane.xlu1 %1088 }
 0x757   :  { %v1091_v42 = vmul.f32 %v1085_v41, %v1085_v41  ;;  %v1090_v43 = vmul.f32 %v1089_v1, %v1803_v52  ;;  %v1093_v55 = vsub.f32 %v1081_v33, %v1085_v41 }
 0x759   :  { %v1092_v45 = vsub.f32 %v1090_v43, %v1091_v42 }
 0x75b   :  { %v1094_v13 = vadd.f32 1e-05, %v1092_v45 }
 0x75d   :  { %1627 = vrsqrt.f32 %v1094_v13  ;;  %vm1101_vm2 = vweird.f32 %v1094_v13  ;;  %v952_v14 = vpop.f32.mrf.mxu2 }
 0x75e   :  { %v953_v19 = vadd.f32 %v1875_v18, %v952_v14 }
 0x763   :  { %v1628_v46 = vpop.eup %1627 }
 0x764   :  { %v1096_v47 = vmul.f32 %v1628_v46, %v1094_v13  ;;  %vm1102_vm1 = vweird.f32 %v1628_v46 }
 0x765   :  { %vm1103_vm3 = vmor %vm1101_vm2, %vm1102_vm1 }
 0x766   :  { %v1097_v49 = vmul.f32 %v1628_v46, %v1096_v47 }
 0x768   :  { %v1098_v50 = vmul.f32 0.5, %v1097_v49 }
 0x76a   :  { %v1099_v38 = vsub.f32 1.5, %v1098_v50 }
 0x76c   :  { %v1100_v51 = vmul.f32 %v1628_v46, %v1099_v38 }
 0x76e   :  { %v1104_v52 = vsel %vm1103_vm3, %v1628_v46, %v1100_v51 }
 0x76f   :  { %v1105_v59 = vmul.f32 %v1104_v52, %v1093_v55  ;;  %v1590_v55 = vld [vmem:[#allocation4 + $0x1e] ss:$0 sm:$0xff]  ;;  %v1591_v52 = vld [vmem:[#allocation4 + $0x1f] ss:$0 sm:$0xff] }
 0x771   :  { %v1108_v60 = vmul.f32 %v1583_v56, %v1105_v59 }
 0x773   :  { %v1111_v26 = vadd.f32 %v1584_v58, %v1108_v60 }
 0x775   :  { %v1112_v61 = vmul.f32 %v1111_v26, %v1111_v26 }
 0x777   :  { %v1113_v62 = vmul.f32 %v1112_v61, %v1111_v26 }
 0x779   :  { %v1114_v63 = vmul.f32 0.044715, %v1113_v62 }
 0x77b   :  { %v1115_v0 = vadd.f32 %v1114_v63, %v1111_v26 }
 0x77d   :  { %v1116_v2 = vmul.f32 0.7978846, %v1115_v0 }
 0x77f   :  { %1629 = vtanh.f32 %v1116_v2 }
 0x785   :  { %v1630_v4 = vpop.eup %1629 }
 0x786   :  { %v1118_v7 = vadd.f32 1.0, %v1630_v4 }
 0x788   :  { %v1119_v37 = vmul.f32 0.5, %v1118_v7 }
 0x78a   :  { %v1120_v8 = vmul.f32 %v1119_v37, %v1111_v26  ;;  %v1575_v37 = vld [vmem:[#allocation4 + $0x23] ss:$0 sm:$0xff] }
 0x78c   :  { %1528 = vmatmul.msk.f32.vlgmr.msra.gmra.mxu2 %vm56_vm5, %v1120_v8  ;;  %v1297_v8 = vpop.f32.mrf.mxu0 }
 0x78d   :  { %v1301_v6 = vadd.f32 %v1575_v37, %v1297_v8 }
 0x80f   :  { %v1147_v15 = vpop.f32.mrf.mxu2 }
 0x810   :  { %v1148_v17 = vadd.f32 %v1586_v5, %v1147_v15 }
 0x812   :  { %1529 = vmatmul.msk.f32.vlgmr.msra.gmra.mxu1 %vm56_vm5, %v1148_v17  ;;  %v1394_v17 = vld [vmem:[#allocation2 + $0x240] sm:$0xff] }
 0x813   :  { %1465 = vmatpush.msra.mxu1 %v1860_v22 }
 0x815   :  { %1466 = vmatpush.msra.mxu1 %v1863_v23  ;;  %v1209_v23 = vld [vmem:[#allocation2 + $0x218] sm:$0xff] }
 0x816   :  { %1233 = vmatpush.msrb.mxu2 %v1209_v23 }
 0x818   :  { %1414 = vmatpush.msra.mxu2 %v1394_v17 }
 0x81a   :  { %1533 = vmatmul.msk.f32.vlgmr.msrb.gmra.mxu1 %vm472_vm8, %v953_v19  ;;  %v1393_v19 = vld [vmem:[#allocation2 + $0x238] sm:$0xff] }
 0x81b   :  { %1415 = vmatpush.msra.mxu2 %v1393_v19 }
 0x88f   :  { %v1176_v22 = vpop.f32.mrf.mxu1 }
 0x890   :  { %v1177_v30 = vadd.f32 %v1587_v29, %v1176_v22 }
 0x892   :  { %v1179_v31 = vadd.f32 %v1177_v30, %v1856_v21  ;;  %v1329_v21 = vld [vmem:[#allocation2 + $0x210] sm:$0xff] }
 0x893   :  { %1347 = vmatpush.msrb.mxu3 %v1329_v21 }
 0x894   :  { %1530 = vmatmul.msk.f32.vlgmr.msra.gmra.mxu3 %vm56_vm5, %v1179_v31 }
 0x895   :  { %1348 = vmatpush.msrb.mxu3 %v1328_v48 }
 0x897   :  { %v1324_v9 = vpop.f32.mrf.mxu1 }
 0x898   :  { %v1327_v10 = vadd.f32 %v1324_v9, %v1301_v6 }
 0x917   :  { %v1206_v33 = vpop.f32.mrf.mxu3 }
 0x918   :  { %v1207_v34 = vadd.f32 %v1588_v32, %v1206_v33 }
 0x91a   :  { %1531 = vmatmul.msk.f32.vlgmr.msrb.gmra.mxu2 %vm56_vm5, %v1207_v34 }
 0x99d   :  { %v1235_v36 = vpop.f32.mrf.mxu2 }
 0x99e   :  { %v1236_v39 = vadd.f32 %v1589_v35, %v1235_v36  ;;  %v1421_v35 = vld [vmem:[#allocation2 + $0x250] sm:$0xff]  ;;  %v1420_v36 = vld [vmem:[#allocation2 + $0x248] sm:$0xff] }
 0x99f   :  { %1441 = vmatpush.msrb.mxu0 %v1421_v35 }
 0x9a0   :  { %v1238_v16 = vsel %vm472_vm8, %v1236_v39, 0.0  ;;  %v1242_v40 = vmul.f32 %v1236_v39, %v1236_v39 }
 0x9a1   :  { %1239 = vadd.xlane.f32.xlu2 %v1238_v16  ;;  %v1592_v16 = vld [vmem:[#allocation4 + $0x20] ss:$0 sm:$0xff]  ;;  %1442 = vmatpush.msrb.mxu0 %v1420_v36 }
 0x9a2   :  { %v1243_v41 = vsel %vm472_vm8, %v1242_v40, 0.0 }
 0x9a3   :  { %1244 = vadd.xlane.f32.xlu0 %v1243_v41  ;;  %v1593_v41 = vld [vmem:[#allocation4 + $0x21] ss:$0 sm:$0xff] }
 0xa14   :  { %v1240_v1 = vpop.xlane.xlu2 %1239 }
 0xa15   :  { %v1241_v42 = vmul.f32 %v1240_v1, %v1791_v3 }
 0xa16   :  { %v1245_v43 = vpop.xlane.xlu0 %1244 }
 0xa17   :  { %v1247_v44 = vmul.f32 %v1241_v42, %v1241_v42  ;;  %v1246_v45 = vmul.f32 %v1245_v43, %v1791_v3  ;;  %v1249_v54 = vsub.f32 %v1236_v39, %v1241_v42 }
 0xa19   :  { %v1248_v13 = vsub.f32 %v1246_v45, %v1247_v44 }
 0xa1b   :  { %v1250_v46 = vadd.f32 1e-05, %v1248_v13 }
 0xa1d   :  { %1631 = vrsqrt.f32 %v1250_v46  ;;  %vm1257_vm4 = vweird.f32 %v1250_v46 }
 0xa23   :  { %v1632_v47 = vpop.eup %1631 }
 0xa24   :  { %v1252_v49 = vmul.f32 %v1632_v47, %v1250_v46  ;;  %vm1258_vm5 = vweird.f32 %v1632_v47 }
 0xa25   :  { %vm1259_vm6 = vmor %vm1257_vm4, %vm1258_vm5 }
 0xa26   :  { %v1253_v50 = vmul.f32 %v1632_v47, %v1252_v49 }
 0xa28   :  { %v1254_v38 = vmul.f32 0.5, %v1253_v50  ;;  %v1594_v50 = vld [vmem:[#allocation4 + $0x24] ss:$0 sm:$0xff] }
 0xa2a   :  { %v1255_v51 = vsub.f32 1.5, %v1254_v38 }
 0xa2c   :  { %v1256_v53 = vmul.f32 %v1632_v47, %v1255_v51 }
 0xa2e   :  { %v1260_v56 = vsel %vm1259_vm6, %v1632_v47, %v1256_v53  ;;  %v1472_v53 = vld [vmem:[#allocation2 + $0x28] sm:$0xff] }
 0xa2f   :  { %v1261_v57 = vmul.f32 %v1260_v56, %v1249_v54  ;;  %v1471_v54 = vld [vmem:[#allocation2 + $0x20] sm:$0xff]  ;;  %1492 = vmatpush.msra.mxu3 %v1472_v53 }
 0xa31   :  { %v1264_v58 = vmul.f32 %v1590_v55, %v1261_v57  ;;  %1493 = vmatpush.msra.mxu3 %v1471_v54  ;;  %v1595_v55 = vld [vmem:[#allocation4 + $0x25] ss:$0 sm:$0xff] }
 0xa33   :  { %v1267_v59 = vadd.f32 %v1591_v52, %v1264_v58 }
 0xa35   :  { %v1268_v60 = vmul.f32 %v1267_v59, %v1267_v59 }
 0xa37   :  { %v1269_v26 = vmul.f32 %v1268_v60, %v1267_v59  ;;  %v1596_v60 = vld [vmem:[#allocation4 + $0x4] ss:$0 sm:$0xff] }
 0xa39   :  { %v1270_v61 = vmul.f32 0.044715, %v1269_v26 }
 0xa3b   :  { %v1271_v62 = vadd.f32 %v1270_v61, %v1267_v59 }
 0xa3d   :  { %v1272_v63 = vmul.f32 0.7978846, %v1271_v62 }
 0xa3f   :  { %1633 = vtanh.f32 %v1272_v63 }
 0xa45   :  { %v1634_v0 = vpop.eup %1633 }
 0xa46   :  { %v1274_v2 = vadd.f32 1.0, %v1634_v0 }
 0xa48   :  { %v1275_v4 = vmul.f32 0.5, %v1274_v2 }
 0xa4a   :  { %v1887_v7 = vmul.f32 %v1275_v4, %v1267_v59 }
 0xa4c   :  { %1534 = vmatmul.msk.f32.vlgmr.msrb.gmra.mxu3 %vm472_vm8, %v1887_v7 }
 0xacf   :  { %v1350_v11 = vpop.f32.mrf.mxu3 }
 0xad0   :  { %v1353_v12 = vadd.f32 %v1350_v11, %v1327_v10 }
 0xad2   :  { %v1354_v14 = vsel %vm472_vm8, %v1353_v12, 0.0  ;;  %v1358_v5 = vmul.f32 %v1353_v12, %v1353_v12 }
 0xad3   :  { %1355 = vadd.xlane.f32.xlu1 %v1354_v14 }
 0xad4   :  { %v1359_v15 = vsel %vm472_vm8, %v1358_v5, 0.0 }
 0xad5   :  { %1360 = vadd.xlane.f32.xlu2 %v1359_v15 }
 0xb46   :  { %v1356_v20 = vpop.xlane.xlu1 %1355 }
 0xb47   :  { %v1357_v24 = vmul.f32 %v1356_v20, %v1791_v3 }
 0xb48   :  { %v1361_v25 = vpop.xlane.xlu2 %1360 }
 0xb49   :  { %v1363_v27 = vmul.f32 %v1357_v24, %v1357_v24  ;;  %v1362_v28 = vmul.f32 %v1361_v25, %v1791_v3  ;;  %v1365_v39 = vsub.f32 %v1353_v12, %v1357_v24 }
 0xb4b   :  { %v1364_v29 = vsub.f32 %v1362_v28, %v1363_v27 }
 0xb4d   :  { %v1366_v22 = vadd.f32 1e-05, %v1364_v29 }
 0xb4f   :  { %1635 = vrsqrt.f32 %v1366_v22  ;;  %vm1373_vm9 = vweird.f32 %v1366_v22 }
 0xb55   :  { %v1636_v30 = vpop.eup %1635 }
 0xb56   :  { %v1368_v31 = vmul.f32 %v1636_v30, %v1366_v22  ;;  %vm1374_vm7 = vweird.f32 %v1636_v30 }
 0xb57   :  { %vm1375_vm10 = vmor %vm1373_vm9, %vm1374_vm7 }
 0xb58   :  { %v1369_v23 = vmul.f32 %v1636_v30, %v1368_v31 }
 0xb5a   :  { %v1370_v32 = vmul.f32 0.5, %v1369_v23 }
 0xb5c   :  { %v1371_v33 = vsub.f32 1.5, %v1370_v32 }
 0xb5e   :  { %v1372_v34 = vmul.f32 %v1636_v30, %v1371_v33 }
 0xb60   :  { %v1376_v40 = vsel %vm1375_vm10, %v1636_v30, %v1372_v34 }
 0xb61   :  { %v1377_v3 = vmul.f32 %v1376_v40, %v1365_v39 }
 0xb63   :  { %v1380_v21 = vmul.f32 %v1592_v16, %v1377_v3 }
 0xb65   :  { %v1383_v48 = vadd.f32 %v1593_v41, %v1380_v21 }
 0xb67   :  { %v1384_v1 = vmul.f32 %v1383_v48, %v1383_v48 }
 0xb69   :  { %v1385_v42 = vmul.f32 %v1384_v1, %v1383_v48 }
 0xb6b   :  { %v1386_v43 = vmul.f32 0.044715, %v1385_v42 }
 0xb6d   :  { %v1387_v44 = vadd.f32 %v1386_v43, %v1383_v48 }
 0xb6f   :  { %v1388_v45 = vmul.f32 0.7978846, %v1387_v44 }
 0xb71   :  { %1637 = vtanh.f32 %v1388_v45 }
 0xb77   :  { %v1638_v13 = vpop.eup %1637 }
 0xb78   :  { %v1390_v46 = vadd.f32 1.0, %v1638_v13 }
 0xb7a   :  { %v1391_v47 = vmul.f32 0.5, %v1390_v46 }
 0xb7c   :  { %v1392_v49 = vmul.f32 %v1391_v47, %v1383_v48 }
 0xb7e   :  { %1535 = vmatmul.msk.f32.vlgmr.msra.gmra.mxu2 %vm472_vm8, %v1392_v49 }
 0xc01   :  { %v1417_v38 = vpop.f32.mrf.mxu2 }
 0xc02   :  { %v1418_v51 = vadd.f32 %v1594_v50, %v1417_v38 }
 0xc04   :  { %1536 = vmatmul.msk.f32.vlgmr.msrb.gmra.mxu0 %vm472_vm8, %v1418_v51 }
 0xc81   :  { %v1444_v56 = vpop.f32.mrf.mxu0 }
 0xc82   :  { %v1445_v52 = vadd.f32 %v1595_v55, %v1444_v56 }
 0xc84   :  { %v1447_v57 = vadd.f32 %v1445_v52, %v1887_v7 }
 0xc86   :  { %1537 = vmatmul.msk.f32.vlgmr.msra.gmra.mxu1 %vm472_vm8, %v1447_v57 }
 0xd03   :  { %v1468_v58 = vpop.f32.mrf.mxu1 }
 0xd04   :  { %v1469_v59 = vadd.f32 %v1875_v18, %v1468_v58 }
 0xd06   :  { %1538 = vmatmul.msk.f32.vlgmr.msra.gmra.mxu3 %vm472_vm8, %v1469_v59 }
 0xd89   :  { %v1495_v26 = vpop.f32.mrf.mxu3 }
 0xd8a   :  { %v1496_v61 = vadd.f32 %v1596_v60, %v1495_v26 }
 0xd8c   :  { %1498 = vst [vmem:[%s1907_s3] sm:$0xff] %v1496_v61 }
 0xd8d   :  { %1503 = vsyncpa [#allocation3], 1 }
 0xd8e   :  { %1504 = vsyncpa [#allocation5], 1 }

</bundles_post_ra>
